<compile_context>
chip_gen: v6e
topology: v6e:2x2x1
jax: 0.10.0
libtpu: 0.0.40
codegen_flags: <defaults>
</compile_context>

<pallas_src>
import functools

import jax
import jax.numpy as jnp
import numpy as np
from jax.experimental import pallas as pl
from jax.experimental.pallas import tpu as pltpu


# ---------------------------------------------------------------------------
# Pallas kernel: fused conv (kh accumulated matmuls) + membrane update +
# pos/neg spiking.  One grid step == one image.
# ---------------------------------------------------------------------------
def _spike_conv_kernel(x_ref, w_ref, b_ref, mem_ref, trans_ref,
                       spike_ref, mem_out_ref, trans_out_ref,
                       *, w_spatial, pos_thresh, neg_thresh):
    hw, coutp = mem_ref.shape            # (H*W, Cout padded to 128)
    kh = w_ref.shape[0]

    # x_ref holds this image's padded, kw-unfolded rows: (Hp*W, kw*Cin), f32.
    x2d = x_ref[...]

    # conv = sum over kh of (row-shifted rows) @ W[ki]; K = kw*Cin per matmul.
    acc = jnp.zeros((hw, coutp), jnp.float32)
    for ki in range(kh):                                     # static, small
        lhs = x2d[ki * w_spatial: ki * w_spatial + hw, :]    # 8-aligned slice
        lhs = lhs.astype(jnp.bfloat16)                       # bf16 MXU path
        acc = acc + jnp.dot(lhs, w_ref[ki],
                            preferred_element_type=jnp.float32)
    conv = acc + b_ref[...]                                  # folded BN bias

    # membrane / spiking update (PyTorch forward semantics)
    mem = mem_ref[...] + conv                                # self.mem += x
    pos = jnp.where(mem >= pos_thresh, pos_thresh, 0.0)
    neg = jnp.where(jnp.logical_and(mem <= neg_thresh, trans_ref[...] > 0.0),
                    neg_thresh, 0.0)
    spike = pos + neg

    spike_ref[...] = spike
    mem_out_ref[...] = mem - spike                           # self.mem -= spike
    trans_out_ref[...] = trans_ref[...] + spike              # self.transmitted += spike


# ---------------------------------------------------------------------------
# Parameter preparation (compute_Conv_weight equivalent + kernel layout)
# ---------------------------------------------------------------------------
def fold_bn_into_conv(conv_w, conv_b, bn_gamma, bn_beta, run_mean, run_var,
                      eps=1e-5):
    """Equivalent of SPIKE_PosNeg_layer_BN.compute_Conv_weight (plain JAX)."""
    safe_std = jnp.sqrt(run_var + eps)                       # (Cout,)
    w_fold = conv_w * (bn_gamma / safe_std)[:, None, None, None]
    b_fold = bn_gamma / safe_std * (conv_b - run_mean) + bn_beta
    return w_fold, b_fold


def prepare_conv_params(w_fold, b_fold, lane=128):
    """(Cout,Cin,kh,kw) -> (kh, kw*Cin, Cout_padded) bf16 + (1, Cout_padded) f32."""
    c_out, c_in, kh, kw = w_fold.shape
    c_out_p = ((c_out + lane - 1) // lane) * lane
    wk = jnp.transpose(w_fold, (2, 3, 1, 0)).reshape(kh, kw * c_in, c_out)
    wk = jnp.pad(wk, ((0, 0), (0, 0), (0, c_out_p - c_out)))
    wk = wk.astype(jnp.bfloat16)
    b = jnp.pad(b_fold, (0, c_out_p - c_out)).reshape(1, c_out_p)
    return wk, b.astype(jnp.float32)


# ---------------------------------------------------------------------------
# One timestep (jitted).  State is carried in the lane-dense rows layout.
# ---------------------------------------------------------------------------
@functools.partial(jax.jit,
                   static_argnames=("kh", "kw", "pos_thresh", "neg_thresh"))
def _spike_step(x_nchw, mem_rows, trans_rows, w_kmat, b_row, *,
                kh, kw, pos_thresh, neg_thresh):
    n, c_in, h, w = x_nchw.shape
    c_out_p = w_kmat.shape[-1]
    hw = h * w
    ph, pw = kh // 2, kw // 2                 # 'SAME' padding for odd kernels
    hp = h + 2 * ph

    # Layout / lowering assumptions (kept simple for this layer's shapes).
    assert kh % 2 == 1 and kw % 2 == 1, "odd square-ish kernels only (SAME pad)"
    assert hw % 8 == 0 and (hp * w) % 8 == 0, "spatial rows must be 8-aligned"
    # TODO(synk): pad rows / add halo-tiled H blocks (manual DMA) for spatial
    # sizes that are not 8-aligned or images too large for one VMEM block.

    # --- glue: NCHW -> NHWC, spatial zero-pad, kw-unfold (kw x, not kh*kw x) -
    x_nhwc = jnp.transpose(x_nchw, (0, 2, 3, 1)).astype(jnp.float32)
    xp = jnp.pad(x_nhwc, ((0, 0), (ph, ph), (pw, pw), (0, 0)))
    xw = jnp.concatenate([xp[:, :, j:j + w, :] for j in range(kw)], axis=-1)
    xw_rows = xw.reshape(n * hp * w, kw * c_in)          # (N*Hp*W, kw*Cin)

    kernel = functools.partial(_spike_conv_kernel, w_spatial=w,
                               pos_thresh=float(pos_thresh),
                               neg_thresh=float(neg_thresh))

    row_spec = pl.BlockSpec((hw, c_out_p), lambda i: (i, 0))
    out_sds = jax.ShapeDtypeStruct((n * hw, c_out_p), jnp.float32)

    spike_r, mem_r, trans_r = pl.pallas_call(
        kernel,
        out_shape=(out_sds, out_sds, out_sds),
        grid_spec=pltpu.PrefetchScalarGridSpec(
            num_scalar_prefetch=0,
            grid=(n,),                                    # one image per step
            in_specs=[
                pl.BlockSpec((hp * w, kw * c_in), lambda i: (i, 0)),   # x rows
                pl.BlockSpec((kh, kw * c_in, c_out_p),
                             lambda i: (0, 0, 0)),                     # weights
                pl.BlockSpec((1, c_out_p), lambda i: (0, 0)),          # bias
                row_spec,                                              # mem
                row_spec,                                              # trans
            ],
            out_specs=[row_spec, row_spec, row_spec],
        ),
        input_output_aliases={3: 1, 4: 2},                # in-place state
        compiler_params=pltpu.CompilerParams(
            dimension_semantics=("parallel",),
            vmem_limit_bytes=32 * 1024 * 1024),
    )(xw_rows, w_kmat, b_row, mem_rows, trans_rows)
    return spike_r, mem_r, trans_r


def spike_posneg_bn_forward(x_nchw, mem_rows, trans_rows, t, w_kmat, b_row,
                            pos_thresh, neg_thresh, kh, kw):
    """One forward step.  Returns (spike_rows, mem_rows, trans_rows).

    `t == 0` resets `transmitted` (as in the PyTorch forward).  State stays in
    the (N*H*W, Cout_padded) rows layout across timesteps.
    """
    if t == 0:
        trans_rows = jnp.zeros_like(trans_rows)
    return _spike_step(x_nchw, mem_rows, trans_rows, w_kmat, b_row,
                       kh=kh, kw=kw,
                       pos_thresh=float(pos_thresh),
                       neg_thresh=float(neg_thresh))


def rows_to_nchw(rows, n, h, w, c_out):
    """Egress helper: (N*H*W, Cout_padded) -> NCHW with padding lanes dropped."""
    return jnp.transpose(rows.reshape(n, h, w, -1)[..., :c_out], (0, 3, 1, 2))


# ---------------------------------------------------------------------------
# Pure-JAX reference (mirrors the PyTorch forward; matched matmul precision)
# ---------------------------------------------------------------------------
def _reference_forward(x, mem, trans, t, w_fold, b_fold, pos_th, neg_th):
    conv = jax.lax.conv_general_dilated(
        x.astype(jnp.bfloat16), w_fold.astype(jnp.bfloat16),
        window_strides=(1, 1), padding="SAME",
        dimension_numbers=("NCHW", "OIHW", "NCHW"),
        preferred_element_type=jnp.float32)
    conv = conv + b_fold[None, :, None, None]
    if t == 0:
        trans = jnp.zeros_like(conv)
    mem = mem + conv
    pos = (mem >= pos_th).astype(jnp.float32) * pos_th
    neg = (mem <= neg_th).astype(jnp.float32) * neg_th
    compare = jnp.where(trans > 0, 1.0, 0.0)
    spike = pos + neg * compare
    return spike, mem - spike, trans + spike


if __name__ == "__main__":
    key = jax.random.PRNGKey(0)
    k_x0, k_x1, k_w, k_b, k_g, k_be, k_rm, k_rv = jax.random.split(key, 8)

    # small shapes consistent with a Conv2d(4 -> 8, 3x3, padding=1) layer
    N, C_IN, H, W = 2, 4, 16, 16
    C_OUT, KH, KW = 8, 3, 3
    POS_THRESH, NEG_THRESH = 1.0, -1.0

    x0 = jax.random.normal(k_x0, (N, C_IN, H, W), jnp.float32)
    x1 = jax.random.normal(k_x1, (N, C_IN, H, W), jnp.float32)

    conv_w = jax.random.normal(k_w, (C_OUT, C_IN, KH, KW), jnp.float32) * 0.2
    conv_b = jax.random.normal(k_b, (C_OUT,), jnp.float32) * 0.1
    bn_gamma = 1.0 + 0.1 * jax.random.normal(k_g, (C_OUT,), jnp.float32)
    bn_beta = 0.1 * jax.random.normal(k_be, (C_OUT,), jnp.float32)
    run_mean = 0.1 * jax.random.normal(k_rm, (C_OUT,), jnp.float32)
    run_var = jnp.abs(jax.random.normal(k_rv, (C_OUT,), jnp.float32)) + 0.5

    # compute_Conv_weight equivalent: fold BN into the conv, then pack weights
    # into the kernel's (kh, kw*Cin, Cout_padded) bf16 layout once up front.
    w_fold, b_fold = fold_bn_into_conv(conv_w, conv_b, bn_gamma, bn_beta,
                                       run_mean, run_var, eps=1e-5)
    w_kmat, b_row = prepare_conv_params(w_fold, b_fold)
    C_OUT_P = w_kmat.shape[-1]

    # initial state (self.mem = 0; self.transmitted set at t == 0), rows layout
    mem_rows = jnp.zeros((N * H * W, C_OUT_P), jnp.float32)
    trans_rows = jnp.zeros((N * H * W, C_OUT_P), jnp.float32)

    # --- t = 0 --------------------------------------------------------------
    spike0_r, mem_rows, trans_rows = spike_posneg_bn_forward(
        x0, mem_rows, trans_rows, 0, w_kmat, b_row, POS_THRESH, NEG_THRESH,
        KH, KW)
    # --- t = 1 (state carried in rows layout) -------------------------------
    spike1_r, mem_rows, trans_rows = spike_posneg_bn_forward(
        x1, mem_rows, trans_rows, 1, w_kmat, b_row, POS_THRESH, NEG_THRESH,
        KH, KW)
    jax.block_until_ready((spike0_r, spike1_r, mem_rows, trans_rows))

    spike0 = rows_to_nchw(spike0_r, N, H, W, C_OUT)
    spike1 = rows_to_nchw(spike1_r, N, H, W, C_OUT)
    mem = rows_to_nchw(mem_rows, N, H, W, C_OUT)
    trans = rows_to_nchw(trans_rows, N, H, W, C_OUT)

    # correctness check against a pure-JAX mirror of the PyTorch forward
    r_mem = jnp.zeros((N, C_OUT, H, W), jnp.float32)
    r_trans = jnp.zeros((N, C_OUT, H, W), jnp.float32)
    r_spike0, r_mem, r_trans = _reference_forward(
        x0, r_mem, r_trans, 0, w_fold, b_fold, POS_THRESH, NEG_THRESH)
    r_spike1, r_mem, r_trans = _reference_forward(
        x1, r_mem, r_trans, 1, w_fold, b_fold, POS_THRESH, NEG_THRESH)

    np.testing.assert_allclose(np.asarray(spike0), np.asarray(r_spike0),
                               atol=1e-4, rtol=1e-4)
    np.testing.assert_allclose(np.asarray(spike1), np.asarray(r_spike1),
                               atol=1e-4, rtol=1e-4)
    np.testing.assert_allclose(np.asarray(mem), np.asarray(r_mem),
                               atol=1e-4, rtol=1e-4)
    np.testing.assert_allclose(np.asarray(trans), np.asarray(r_trans),
                               atol=1e-4, rtol=1e-4)

    print("KERNEL_OK")
</pallas_src>

<mosaic_0001>
module attributes {stable_mosaic.version = 11 : i64} {
  func.func @_spike_conv_kernel(%arg0: i32, %arg1: memref<288x12xf32, #tpu.memory_space<vmem>>, %arg2: memref<3x12x128xbf16, #tpu.memory_space<vmem>>, %arg3: memref<1x128xf32, #tpu.memory_space<vmem>>, %arg4: memref<256x128xf32, #tpu.memory_space<vmem>>, %arg5: memref<256x128xf32, #tpu.memory_space<vmem>>, %arg6: memref<256x128xf32, #tpu.memory_space<vmem>>, %arg7: memref<256x128xf32, #tpu.memory_space<vmem>>, %arg8: memref<256x128xf32, #tpu.memory_space<vmem>>) attributes {dimension_semantics = [#tpu.dimension_semantics<parallel>], iteration_bounds = array<i64: 2>, scalar_prefetch = 0 : i64, scratch_operands = 0 : i64, tpu.core_type = #tpu.core_type<tc>, window_params = [{transform_indices = @transform_0, window_bounds = array<i64: 288, 12>}, {pipeline_mode = #tpu.pipeline_mode<synchronous>, transform_indices = @transform_1, window_bounds = array<i64: 3, 12, 128>}, {pipeline_mode = #tpu.pipeline_mode<synchronous>, transform_indices = @transform_2, window_bounds = array<i64: 1, 128>}, {transform_indices = @transform_3, window_bounds = array<i64: 256, 128>}, {transform_indices = @transform_4, window_bounds = array<i64: 256, 128>}, {transform_indices = @transform_5, window_bounds = array<i64: 256, 128>}, {transform_indices = @transform_6, window_bounds = array<i64: 256, 128>}, {transform_indices = @transform_7, window_bounds = array<i64: 256, 128>}]} {
    %c0 = arith.constant 0 : index
    %c0_0 = arith.constant 0 : index
    %0 = vector.load %arg1[%c0, %c0_0] : memref<288x12xf32, #tpu.memory_space<vmem>>, vector<288x12xf32>
    %cst = arith.constant 0.000000e+00 : f32
    %1 = vector.broadcast %cst : f32 to vector<256x128xf32>
    %2 = vector.extract_strided_slice %0 {offsets = [0, 0], sizes = [256, 12], strides = [1, 1]} : vector<288x12xf32> to vector<256x12xf32>
    %3 = arith.truncf %2 : vector<256x12xf32> to vector<256x12xbf16>
    %c0_1 = arith.constant 0 : index
    %c0_2 = arith.constant 0 : index
    %c0_3 = arith.constant 0 : index
    %4 = vector.load %arg2[%c0_1, %c0_2, %c0_3] : memref<3x12x128xbf16, #tpu.memory_space<vmem>>, vector<1x12x128xbf16>
    %5 = vector.shape_cast %4 : vector<1x12x128xbf16> to vector<12x128xbf16>
    %cst_4 = arith.constant dense<0.000000e+00> : vector<256x128xf32>
    %6 = tpu.matmul %3, %5, %cst_4 {dimension_numbers = #tpu.dot_dimension_numbers<[1], [0], [0], [1], [0, 0, 1, 1], [], []>} : vector<256x12xbf16>, vector<12x128xbf16>, vector<256x128xf32> -> vector<256x128xf32>
    %7 = arith.addf %1, %6 : vector<256x128xf32>
    %8 = vector.extract_strided_slice %0 {offsets = [16, 0], sizes = [256, 12], strides = [1, 1]} : vector<288x12xf32> to vector<256x12xf32>
    %9 = arith.truncf %8 : vector<256x12xf32> to vector<256x12xbf16>
    %c1 = arith.constant 1 : index
    %c0_5 = arith.constant 0 : index
    %c0_6 = arith.constant 0 : index
    %10 = vector.load %arg2[%c1, %c0_5, %c0_6] : memref<3x12x128xbf16, #tpu.memory_space<vmem>>, vector<1x12x128xbf16>
    %11 = vector.shape_cast %10 : vector<1x12x128xbf16> to vector<12x128xbf16>
    %cst_7 = arith.constant dense<0.000000e+00> : vector<256x128xf32>
    %12 = tpu.matmul %9, %11, %cst_7 {dimension_numbers = #tpu.dot_dimension_numbers<[1], [0], [0], [1], [0, 0, 1, 1], [], []>} : vector<256x12xbf16>, vector<12x128xbf16>, vector<256x128xf32> -> vector<256x128xf32>
    %13 = arith.addf %7, %12 : vector<256x128xf32>
    %14 = vector.extract_strided_slice %0 {offsets = [32, 0], sizes = [256, 12], strides = [1, 1]} : vector<288x12xf32> to vector<256x12xf32>
    %15 = arith.truncf %14 : vector<256x12xf32> to vector<256x12xbf16>
    %c2 = arith.constant 2 : index
    %c0_8 = arith.constant 0 : index
    %c0_9 = arith.constant 0 : index
    %16 = vector.load %arg2[%c2, %c0_8, %c0_9] : memref<3x12x128xbf16, #tpu.memory_space<vmem>>, vector<1x12x128xbf16>
    %17 = vector.shape_cast %16 : vector<1x12x128xbf16> to vector<12x128xbf16>
    %cst_10 = arith.constant dense<0.000000e+00> : vector<256x128xf32>
    %18 = tpu.matmul %15, %17, %cst_10 {dimension_numbers = #tpu.dot_dimension_numbers<[1], [0], [0], [1], [0, 0, 1, 1], [], []>} : vector<256x12xbf16>, vector<12x128xbf16>, vector<256x128xf32> -> vector<256x128xf32>
    %19 = arith.addf %13, %18 : vector<256x128xf32>
    %c0_11 = arith.constant 0 : index
    %c0_12 = arith.constant 0 : index
    %20 = vector.load %arg3[%c0_11, %c0_12] : memref<1x128xf32, #tpu.memory_space<vmem>>, vector<1x128xf32>
    %21 = vector.broadcast %20 : vector<1x128xf32> to vector<256x128xf32>
    %22 = arith.addf %19, %21 : vector<256x128xf32>
    %c0_13 = arith.constant 0 : index
    %c0_14 = arith.constant 0 : index
    %23 = vector.load %arg4[%c0_13, %c0_14] : memref<256x128xf32, #tpu.memory_space<vmem>>, vector<256x128xf32>
    %24 = arith.addf %23, %22 : vector<256x128xf32>
    %cst_15 = arith.constant 1.000000e+00 : f32
    %25 = vector.broadcast %cst_15 : f32 to vector<256x128xf32>
    %26 = arith.cmpf oge, %24, %25 : vector<256x128xf32>
    %cst_16 = arith.constant 1.000000e+00 : f32
    %cst_17 = arith.constant 0.000000e+00 : f32
    %27 = vector.broadcast %cst_16 : f32 to vector<256x128xf32>
    %28 = vector.broadcast %cst_17 : f32 to vector<256x128xf32>
    %29 = arith.select %26, %27, %28 : vector<256x128xi1>, vector<256x128xf32>
    %cst_18 = arith.constant -1.000000e+00 : f32
    %30 = vector.broadcast %cst_18 : f32 to vector<256x128xf32>
    %31 = arith.cmpf ole, %24, %30 : vector<256x128xf32>
    %c0_19 = arith.constant 0 : index
    %c0_20 = arith.constant 0 : index
    %32 = vector.load %arg5[%c0_19, %c0_20] : memref<256x128xf32, #tpu.memory_space<vmem>>, vector<256x128xf32>
    %cst_21 = arith.constant 0.000000e+00 : f32
    %33 = vector.broadcast %cst_21 : f32 to vector<256x128xf32>
    %34 = arith.cmpf ogt, %32, %33 : vector<256x128xf32>
    %35 = arith.andi %31, %34 : vector<256x128xi1>
    %cst_22 = arith.constant -1.000000e+00 : f32
    %cst_23 = arith.constant 0.000000e+00 : f32
    %36 = vector.broadcast %cst_22 : f32 to vector<256x128xf32>
    %37 = vector.broadcast %cst_23 : f32 to vector<256x128xf32>
    %38 = arith.select %35, %36, %37 : vector<256x128xi1>, vector<256x128xf32>
    %39 = arith.addf %29, %38 : vector<256x128xf32>
    %c0_24 = arith.constant 0 : index
    %c0_25 = arith.constant 0 : index
    %40 = vector.load %arg6[%c0_24, %c0_25] : memref<256x128xf32, #tpu.memory_space<vmem>>, vector<256x128xf32>
    tpu.vector_store %arg6[%c0_24, %c0_25], %39 {strides = array<i32>} : memref<256x128xf32, #tpu.memory_space<vmem>>, vector<256x128xf32>,
    %41 = arith.subf %24, %39 : vector<256x128xf32>
    %c0_26 = arith.constant 0 : index
    %c0_27 = arith.constant 0 : index
    %42 = vector.load %arg7[%c0_26, %c0_27] : memref<256x128xf32, #tpu.memory_space<vmem>>, vector<256x128xf32>
    tpu.vector_store %arg7[%c0_26, %c0_27], %41 {strides = array<i32>} : memref<256x128xf32, #tpu.memory_space<vmem>>, vector<256x128xf32>,
    %c0_28 = arith.constant 0 : index
    %c0_29 = arith.constant 0 : index
    %43 = vector.load %arg5[%c0_28, %c0_29] : memref<256x128xf32, #tpu.memory_space<vmem>>, vector<256x128xf32>
    %44 = arith.addf %43, %39 : vector<256x128xf32>
    %c0_30 = arith.constant 0 : index
    %c0_31 = arith.constant 0 : index
    %45 = vector.load %arg8[%c0_30, %c0_31] : memref<256x128xf32, #tpu.memory_space<vmem>>, vector<256x128xf32>
    tpu.vector_store %arg8[%c0_30, %c0_31], %44 {strides = array<i32>} : memref<256x128xf32, #tpu.memory_space<vmem>>, vector<256x128xf32>,
    return
  }
  func.func @transform_0(%arg0: i32) -> (i32, i32) {
    %c0_i32 = arith.constant 0 : i32
    %c0_i32_0 = arith.constant 0 : i32
    return %arg0, %c0_i32 : i32, i32
  }
  func.func @transform_1(%arg0: i32) -> (i32, i32, i32) {
    %c0_i32 = arith.constant 0 : i32
    %c0_i32_0 = arith.constant 0 : i32
    %c0_i32_1 = arith.constant 0 : i32
    %c0_i32_2 = arith.constant 0 : i32
    return %c0_i32, %c0_i32_0, %c0_i32_1 : i32, i32, i32
  }
  func.func @transform_2(%arg0: i32) -> (i32, i32) {
    %c0_i32 = arith.constant 0 : i32
    %c0_i32_0 = arith.constant 0 : i32
    %c0_i32_1 = arith.constant 0 : i32
    return %c0_i32, %c0_i32_0 : i32, i32
  }
  func.func @transform_3(%arg0: i32) -> (i32, i32) {
    %c0_i32 = arith.constant 0 : i32
    %c0_i32_0 = arith.constant 0 : i32
    return %arg0, %c0_i32 : i32, i32
  }
  func.func @transform_4(%arg0: i32) -> (i32, i32) {
    %c0_i32 = arith.constant 0 : i32
    %c0_i32_0 = arith.constant 0 : i32
    return %arg0, %c0_i32 : i32, i32
  }
  func.func @transform_5(%arg0: i32) -> (i32, i32) {
    %c0_i32 = arith.constant 0 : i32
    %c0_i32_0 = arith.constant 0 : i32
    return %arg0, %c0_i32 : i32, i32
  }
  func.func @transform_6(%arg0: i32) -> (i32, i32) {
    %c0_i32 = arith.constant 0 : i32
    %c0_i32_0 = arith.constant 0 : i32
    return %arg0, %c0_i32 : i32, i32
  }
  func.func @transform_7(%arg0: i32) -> (i32, i32) {
    %c0_i32 = arith.constant 0 : i32
    %c0_i32_0 = arith.constant 0 : i32
    return %arg0, %c0_i32 : i32, i32
  }
}

</mosaic_0001>

<bundles_post_ra>
// kernel: _spike_step.1
= control target key start
LH: loop header
LB: loop body
LE: loop exit
PB: predicated region body
PF: predicated region fallthrough
CT: control target
= control target key end

     0   :  { %s3483_s0 = inlined_call_operand.vmem [shape: f32[576,12], index: 0, kind: input, shape index: {}]   ;;  %s3484_s1 = inlined_call_operand.vmem [shape: bf16[3,12,128], index: 1, kind: input, shape index: {}]   ;;  %s3485_s2 = inlined_call_operand.vmem [shape: f32[1,128], index: 2, kind: input, shape index: {}]   ;;  %s3486_s3 = inlined_call_operand.hbm [shape: f32[512,128], index: 3, kind: input, shape index: {}, may-alias: {3,6}]   ;;  %s3487_s4 = inlined_call_operand.hbm [shape: f32[512,128], index: 4, kind: input, shape index: {}, may-alias: {4,7}]   ;;  %s3488_s5 = inlined_call_operand.hbm [shape: f32[512,128], index: 5, kind: output, shape index: {0}]   ;;  %s3489_s6 = inlined_call_operand.hbm [shape: f32[512,128], index: 6, kind: output, shape index: {1}, may-alias: {3,6}]   ;;  %s3490_s7 = inlined_call_operand.hbm [shape: f32[512,128], index: 7, kind: output, shape index: {2}, may-alias: {4,7}]  }
   0x1   :  { %3497 = sst [smem:[#allocation16_spill]] %s3483_s0 }
   0x2   :  { %3498 = sst [smem:[#allocation17_spill]] %s3484_s1 }
   0x3   :  { %3499 = sst [smem:[#allocation18_spill]] %s3486_s3 }
   0x4   :  { %13 = vsyncpa [#allocation3], 0 }
   0x5   :  { %15 = vsyncpa [#allocation3 + $0x1], 0 }
   0x6   :  { %16 = vsyncpa [#allocation6], 0 }
   0x7   :  { %18 = vsyncpa [#allocation6 + $0x1], 0 }
   0x8   :  { %19 = vsyncpa [#allocation4], 0 }
   0x9   :  { %21 = vsyncpa [#allocation4 + $0x1], 0 }
   0xa   :  { %22 = vsyncpa [#allocation9], 0 }
   0xb   :  { %24 = vsyncpa [#allocation9 + $0x1], 0  ;;  %s2365_s24 = smov 0   ;;  %s2367_s25 = smov 0  }
   0xc   :  { %s2369_s26 = smov 0   ;;  %s2371_s27 = smov 0  }
   0xd LB: > { %s2386_s28 = sadd.s32 4294967295, %s2313_s27   ;;  %s3491_s29 = sadd.s32 4294967294, %s2313_s27   ;;  %s2313_s27 = sphi %s2371_s27, %s3524_s27   ;;  %s2309_s26 = sphi %s2369_s26, %s3523_s26   ;;  %s2305_s25 = sphi %s2367_s25, %s3522_s25   ;;  %s2301_s24 = sphi %s2365_s24, %s3521_s24  }
   0xe   : > { %s2390_s30 = sadd.s32 1, %s2313_s27   ;;  %s105_s8 = sadd.s32 1, %s2309_s26 }
   0xf   : > { %s102_s9 = ssub.s32 %s2313_s27, %s2390_s30  ;;  %p112_p0 = scmp.ne.s32.totalorder %s2309_s26, %s2305_s25 }
  0x10   : > { %p103_p1 = scmp.eq.s32.totalorder %s102_s9, 0  ;;  %p113_p2 = scmp.eq.s32.totalorder %s2313_s27, 0 }
  0x11   : > { %p118_p3 = scmp.ne.s32.totalorder %s2305_s25, %s2301_s24  ;;  %p119_p4 = scmp.eq.s32.totalorder %s2386_s28, 0 }
  0x12   : > { %s2402_s10 = scalar_select %p103_p1, %s2309_s26, %s105_s8  }
  0x13   : > { %p2404_p5 = por %p113_p2, %p112_p0  ;;  %p2408_p6 = por %p119_p4, %p118_p3 }
  0x14   : > { %3500 = sst [smem:[#allocation15_spill]] %s2402_s10  ;;  %p168_p7 = scmp.eq.s32.totalorder %s2386_s28, 1 }
  0x15   : > { %s3502_s12 = scalar_select %p2408_p6, 1, 0 }
  0x16   : > { %p174_p8 = scmp.eq.s32.totalorder %s3491_s29, 1  ;;  %p2090_p10 = scmp.lt.s32.totalorder %s2313_s27, 2 }
  0x17   : > { %p2417_p11 = por %p168_p7, %p112_p0  ;;  %s2426_s15 = sand.u32 1, %s2309_s26  }
  0x18   : > { %p2421_p12 = por %p174_p8, %p118_p3  ;;  %s3493_s16 = sshll.u32 %s2313_s27, 12 }
  0x19   : > { %s3503_s13 = scalar_select %p2417_p11, 1, 0 }
  0x1a   : > { %s3504_s14 = scalar_select %p2421_p12, 1, 0 }
  0x1b   : > { %s3492_s17 = sshll.u32 %s2426_s15, 8  ;;  %s3505_s3 = sld [smem:[#allocation18_spill]] }
  0x1c   : > { %s265_s21 = scalar_lea.vmem [#allocation2], %s3492_s17  ;;  %p2441_p13 = pnand %p2090_p10, %p2404_p5 }
  0x1d   : > { %s272_s22 = sshll.u32 %s265_s21, 4  ;;  %s262_s8 = scalar_lea.sflag [#allocation3], %s2426_s15  ;;  %s2445_s22 = int_to_ptr.vmem [resolvable:$true] %s272_s22 }
  0x1e   : > { %p2135_p1 = pneg %p2441_p13 }
  0x21   : > { %s2435_s20 = scalar_lea.hbm %s3505_s3, %s3493_s16  ;;  %s2138_s11 = scalar_lea.hbm %s3505_s3, 8192 }
  0x22   : > { %s2133_s9 = scalar_lea.hbm %s2435_s20, 4096  ;;  %p2139_p4 = scmp.lt.s32.totalorder %s2435_s20, %s3505_s3 }
  0x23   : > { %p2134_p0 = scmp.ne.s32.totalorder %s2435_s20, %s2133_s9  ;;  %p2140_p5 = scmp.lt.s32.totalorder %s2138_s11, %s2133_s9 }
  0x25   : > { %p2136_p2 = pnand %p2135_p1, %p2134_p0  ;;  %p2141_p7 = por %p2140_p5, %p2139_p4 }
  0x27   : > { %p2137_p3 = pneg %p2136_p2 }
  0x29   : > { %p2142_p8 = pnand %p2141_p7, %p2137_p3 }
  0x2b   : > { %2145 = shalt.err (!%p2142_p8)
}
  0x2c   : > { %s2146_s17 = scalar_lea.vmem %s2445_s22, 4096  ;;  %s2315_s18 = smov [#allocation2]  }
  0x2d   : > { %p2147_p10 = scmp.ne.s32.totalorder %s2445_s22, %s2146_s17  ;;  %s2151_s19 = sshll.u32 %s2315_s18, 4  ;;  %s2152_s19 = int_to_ptr.vmem [resolvable:$false] %s2151_s19 }
  0x2e   : > { %s2153_s16 = scalar_lea.vmem %s2152_s19, 8192  ;;  %p2154_p9 = scmp.lt.s32.totalorder %s2445_s22, %s2152_s19 }
  0x2f   : > { %p2149_p0 = pnand %p2147_p10, %p2135_p1  ;;  %p2155_p12 = scmp.lt.s32.totalorder %s2153_s16, %s2146_s17 }
  0x31   : > { %p2150_p2 = pneg %p2149_p0  ;;  %p2156_p11 = por %p2155_p12, %p2154_p9 }
  0x33   : > { %p2157_p4 = pnand %p2156_p11, %p2150_p2 }
  0x35   : > { %2160 = shalt.err (!%p2157_p4)
}
  0x36   : > { %s3495_s29 = smov 128   ;;  %s2317_s9 = smov 8  }
  0x37   : > { %2076 = dma.hbm_to_vmem [thread:$0]  (!%p2441_p13), %s2435_s20, 4096, %s2445_s22, %s262_s8, %s3495_s29, %s3495_s29, %s2317_s9  }
  0x38   : > { %p1825_p9 = scmp.ge.s32.totalorder %s2313_s27, 1  ;;  %p301_p11 = scmp.lt.s32.totalorder %s2313_s27, 3 }
  0x39   : > { %s3508_s17 = sshll.u32 %s2313_s27, 12  ;;  %s3509_s19 = sshll.u32 %s2426_s15, 8 }
  0x3a   : > { %p2479_p12 = pnand %p1825_p9, %p301_p11  ;;  %s2488_s18 = scalar_lea.hbm %s3487_s4, %s3508_s17 }
  0x3b   : > { %s286_s3 = scalar_lea.vmem [#allocation5], %s3509_s19  ;;  %s283_s20 = scalar_lea.sflag [#allocation6], %s2426_s15 }
  0x3c   : > { %s293_s10 = sshll.u32 %s286_s3, 4  ;;  %s2161_s22 = scalar_lea.hbm %s2488_s18, 4096  ;;  %s2492_s10 = int_to_ptr.vmem [resolvable:$true] %s293_s10 }
  0x3d   : > { %p2162_p3 = scmp.ne.s32.totalorder %s2488_s18, %s2161_s22  ;;  %s2166_s17 = scalar_lea.hbm %s3487_s4, 8192 }
  0x3e   : > { %p2167_p8 = scmp.lt.s32.totalorder %s2488_s18, %s3487_s4  ;;  %p2168_p10 = scmp.lt.s32.totalorder %s2166_s17, %s2161_s22 }
  0x3f   : > { %p2164_p5 = pnand %p2162_p3, %p2135_p1 }
  0x40   : > { %p2169_p0 = por %p2168_p10, %p2167_p8 }
  0x41   : > { %p2165_p7 = pneg %p2164_p5 }
  0x43   : > { %p2170_p2 = pnand %p2169_p0, %p2165_p7 }
  0x45   : > { %2173 = shalt.err (!%p2170_p2)
}
  0x46   : > { %s2174_s3 = scalar_lea.vmem %s2492_s10, 4096  ;;  %s2318_s15 = smov [#allocation5]  }
  0x47   : > { %p2175_p4 = scmp.ne.s32.totalorder %s2492_s10, %s2174_s3  ;;  %s2179_s29 = sshll.u32 %s2318_s15, 4  ;;  %s2180_s29 = int_to_ptr.vmem [resolvable:$false] %s2179_s29 }
  0x48   : > { %s2181_s19 = scalar_lea.vmem %s2180_s29, 8192  ;;  %p2182_p3 = scmp.lt.s32.totalorder %s2492_s10, %s2180_s29 }
  0x49   : > { %p2177_p9 = pnand %p2175_p4, %p2135_p1  ;;  %p2183_p5 = scmp.lt.s32.totalorder %s2181_s19, %s2174_s3 }
  0x4b   : > { %p2178_p11 = pneg %p2177_p9  ;;  %p2184_p6 = por %p2183_p5, %p2182_p3 }
  0x4d   : > { %p2185_p8 = pnand %p2184_p6, %p2178_p11 }
  0x4f   : > { %2188 = shalt.err (!%p2185_p8)
}
  0x50   : > { %s3510_s22 = smov 128   ;;  %305 = sbr.rel (%p2479_p12) target bundleno = 490 (0x1ea), region = 40 }
  0x51   : > { %2079 = dma.hbm_to_vmem [thread:$0]  (!%p2441_p13), %s2488_s18, 4096, %s2492_s10, %s283_s20, %s3510_s22, %s3510_s22, %s2317_s9  }
  0x52   : > { %s2523_s8 = sand.u32 (!%p2479_p12), 1, %s2305_s25   ;;  %p3511_p6 = scmp.ne.s32.totalorder (!%p2479_p12), %s3502_s12, 0 }
  0x53   : > { %s2526_s17 = sshll.u32 (!%p2479_p12), %s2523_s8, 8  ;;  %s308_s11 = scalar_lea.sflag (!%p2479_p12), [#allocation3], %s2523_s8 }
  0x54   : > { %s2530_s23 = scalar_lea.vmem (!%p2479_p12), [#allocation2], %s2526_s17 }
  0x55   : > { %2284 = dma.done.wait (%p3511_p6), %s308_s11, 4096  }
  0x56   : > { %2286 = vsyncadd (%p3511_p6), %s308_s11, 4294963200  ;;  %s317_s10 = scalar_lea.sflag [#allocation6], %s2523_s8  ;;  %s2538_s9 = scalar_lea.vmem [#allocation5], %s2526_s17 }
  0x57   : > { %2288 = dma.done.wait (%p3511_p6), %s317_s10, 4096  }
  0x58   : > { %2290 = vsyncadd (%p3511_p6), %s317_s10, 4294963200  ;;  %s371_s16 = smul.u32 36, %s2386_s28  ;;  %vm495_vm0 = vcmask 1045504   ;;  %s3512_s1 = sld [smem:[#allocation17_spill]]  ;;  %vm446_vm1 = vcmask 97280  }
  0x59   : > { %s3513_s0 = sld [smem:[#allocation16_spill]]  ;;  %s2796_s20 = scalar_lea.vmem [#allocation8], %s2526_s17 }
  0x5a   : > { %p372_p13 = scmp.lt.s32.totalorder %s371_s16, 71  ;;  %s2800_s21 = scalar_lea.vmem [#allocation10], %s2526_s17 }
  0x5b   : > { %s1647_s12 = sshll.u32 %s2800_s21, 4  ;;  %p3514_p12 = scmp.ne.s32.totalorder %s3503_s13, 0  ;;  %s3381_s12 = int_to_ptr.vmem [resolvable:$true] %s1647_s12 }
  0x5c   : > { %s3526_s16 = smov (!%p372_p13, %s371_s16), 71  ;;  %s2320_s10 = smov [#allocation7]  }
  0x5d   : > { %s1831_s18 = sshll.u32 %s3526_s16, 3  ;;  %s2193_s16 = sshll.u32 %s2320_s10, 4  ;;  %s2194_s16 = int_to_ptr.vmem [resolvable:$false] %s2193_s16 }
  0x5e   : > { %v2129_v0 = vld [vmem:[%s3512_s1 + $0x8] sm:$0x3f]   ;;  %v2130_v14 = vld [vmem:[%s3512_s1] sm:$0x3f]   ;;  %v2131_v15 = vld [vmem:[%s3512_s1 + $0x10] sm:$0x3f]  }
  0x5f   : > { %s2551_s29 = scalar_lea.vmem %s3513_s0, %s1831_s18  ;;  %2059 = vmatprep.subr.msk.bf16.mxu0 %vm495_vm0, %v2129_v0  ;;  %2060 = vmatprep.subr.msk.bf16.mxu1 %vm495_vm0, %v2129_v0  ;;  %v497_v4 = vsel %vm495_vm0, %v2129_v0, 0  ;;  %v669_v17 = vsel %vm495_vm0, %v2130_v14, 0  ;;  %v845_v21 = vsel %vm495_vm0, %v2131_v15, 0  ;;  %s2781_s18 = scalar_lea.vmem [#allocation7], %s2526_s17 }
  0x60   : > { %v385_v1 = vld [vmem:[%s2551_s29 + $0x10] sm:$0xff]  ;;  %v386_v2 = vld [vmem:[%s2551_s29 + $0x18] sm:$0xff]  ;;  %v387_v7 = vld [vmem:[%s2551_s29 + $0x20] sm:$0xff]  ;;  %1956 = vmatpush3.bf16.msra.mxu0 %v497_v4  ;;  %2058 = vmatpush3.bf16.msra.mxu1 %v497_v4  ;;  %s2195_s15 = scalar_lea.vmem %s2194_s16, 8192 }
  0x61   : > { %v401_v3 = vld [vmem:[%s2551_s29 + $0x90] sm:$0xff]  ;;  %v2559_v5 = vpack.c.bf16 %v386_v2, %v385_v1  ;;  %v402_v6 = vld [vmem:[%s2551_s29 + $0x98] sm:$0xff]  ;;  %v388_v8 = vld [vmem:[%s2551_s29 + $0x28] sm:$0xff]  ;;  %2061 = vmatprep.subr.msk.bf16.mxu1 %vm495_vm0, %v2130_v14  ;;  %2062 = vmatprep.subr.msk.bf16.mxu0 %vm495_vm0, %v2131_v15 }
  0x62   : > { %v2564_v9 = vpack.c.bf16 %v402_v6, %v401_v3  ;;  %v2566_v10 = vpack.c.bf16 %v388_v8, %v387_v7  ;;  %v403_v11 = vld [vmem:[%s2551_s29 + $0xa0] sm:$0xff]  ;;  %v404_v12 = vld [vmem:[%s2551_s29 + $0xa8] sm:$0xff]  ;;  %v389_v16 = vld [vmem:[%s2551_s29 + $0x30] sm:$0xff] }
  0x63   : > { %1957 = vmatprep.mubr.msk.bf16.mxu0 %vm446_vm1, %v2559_v5  ;;  %v2572_v13 = vpack.c.bf16 %v404_v12, %v403_v11  ;;  %v390_v18 = vld [vmem:[%s2551_s29 + $0x38] sm:$0xff]  ;;  %v405_v19 = vld [vmem:[%s2551_s29 + $0xb0] sm:$0xff]  ;;  %v391_v24 = vld [vmem:[%s2551_s29 + $0x40] sm:$0xff] }
  0x64   : > { %1973 = vmatprep.mubr.msk.bf16.mxu1 %vm446_vm1, %v2564_v9  ;;  %1958 = vmatmul.mubr.msk.bf16.vlgmr.msra.gmra.mxu0 %vm446_vm1, %v2566_v10  ;;  %v406_v20 = vld [vmem:[%s2551_s29 + $0xb8] sm:$0xff]  ;;  %v422_v22 = vpack.c.bf16 %v390_v18, %v389_v16  ;;  %v392_v25 = vld [vmem:[%s2551_s29 + $0x48] sm:$0xff]  ;;  %v407_v26 = vld [vmem:[%s2551_s29 + $0xc0] sm:$0xff] }
  0x65   : > { %1974 = vmatmul.mubr.msk.bf16.vlgmr.msra.gmra.mxu1 %vm446_vm1, %v2572_v13  ;;  %v2594_v23 = vpack.c.bf16 %v406_v20, %v405_v19  ;;  %2024 = vmatpush3.bf16.msra.mxu0 %v845_v21  ;;  %v408_v27 = vld [vmem:[%s2551_s29 + $0xc8] sm:$0xff]  ;;  %v393_v28 = vld [vmem:[%s2551_s29 + $0x50] sm:$0xff]  ;;  %v394_v29 = vld [vmem:[%s2551_s29 + $0x58] sm:$0xff]  ;;  %v423_v32 = vpack.c.bf16 %v392_v25, %v391_v24 }
  0x66   : > { %1990 = vmatpush3.bf16.msra.mxu1 %v669_v17  ;;  %1961 = vmatprep.mubr.msk.bf16.mxu0 %vm446_vm1, %v422_v22  ;;  %v409_v30 = vld [vmem:[%s2551_s29 + $0xd0] sm:$0xff]  ;;  %v410_v31 = vld [vmem:[%s2551_s29 + $0xd8] sm:$0xff]  ;;  %v431_v33 = vpack.c.bf16 %v408_v27, %v407_v26  ;;  %v424_v34 = vpack.c.bf16 %v394_v29, %v393_v28  ;;  %v395_v36 = vld [vmem:[%s2551_s29 + $0x60] sm:$0xff] }
  0x67   : > { %1977 = vmatprep.mubr.msk.bf16.mxu1 %vm446_vm1, %v2594_v23  ;;  %v432_v35 = vpack.c.bf16 %v410_v31, %v409_v30  ;;  %v396_v37 = vld [vmem:[%s2551_s29 + $0x68] sm:$0xff]  ;;  %v411_v38 = vld [vmem:[%s2551_s29 + $0xe0] sm:$0xff]  ;;  %v397_v40 = vld [vmem:[%s2551_s29 + $0x70] sm:$0xff] }
  0x68   : > { %v412_v39 = vld [vmem:[%s2551_s29 + $0xe8] sm:$0xff]  ;;  %v398_v41 = vld [vmem:[%s2551_s29 + $0x78] sm:$0xff]  ;;  %v413_v42 = vld [vmem:[%s2551_s29 + $0xf0] sm:$0xff]  ;;  %v425_v44 = vpack.c.bf16 %v396_v37, %v395_v36 }
  0x69   : > { %v414_v43 = vld [vmem:[%s2551_s29 + $0xf8] sm:$0xff]  ;;  %v433_v45 = vpack.c.bf16 %v412_v39, %v411_v38  ;;  %v426_v46 = vpack.c.bf16 %v398_v41, %v397_v40  ;;  %v399_v48 = vld [vmem:[%s2551_s29 + $0x80] sm:$0xff]  ;;  %v400_v49 = vld [vmem:[%s2551_s29 + $0x88] sm:$0xff] }
  0x6a   : > { %v434_v47 = vpack.c.bf16 %v414_v43, %v413_v42  ;;  %v415_v50 = vld [vmem:[%s2551_s29 + $0x100] sm:$0xff]  ;;  %v416_v51 = vld [vmem:[%s2551_s29 + $0x108] sm:$0xff]  ;;  %v427_v54 = vpack.c.bf16 %v400_v49, %v399_v48  ;;  %v417_v57 = vld [vmem:[%s2551_s29 + $0x110] sm:$0xff] }
  0x6b   : > { %v383_v52 = vld [vmem:[%s2551_s29] sm:$0xff]  ;;  %v384_v53 = vld [vmem:[%s2551_s29 + $0x8] sm:$0xff]  ;;  %v437_v55 = vpack.c.bf16 %v416_v51, %v415_v50  ;;  %v418_v58 = vld [vmem:[%s2551_s29 + $0x118] sm:$0xff]  ;;  %s1631_s29 = sshll.u32 %s2796_s20, 4  ;;  %s3379_s29 = int_to_ptr.vmem [resolvable:$true] %s1631_s29 }
  0x6c   : > { %1962 = vmatmul.mubr.msk.bf16.gmra.mxu0 %vm446_vm1, %v423_v32  ;;  %v419_v56 = vpack.c.bf16 %v384_v53, %v383_v52  ;;  %v832_v59 = vpack.c.bf16 %v418_v58, %v417_v57  ;;  %v2733_v31 = vld [vmem:[%s3485_s2] ss:$0 sm:$0xff]  ;;  %v1081_v37 = vld [vmem:[%s2530_s23 + $0x10] sm:$0xff] }
  0x6d   : > { %1978 = vmatmul.mubr.msk.bf16.gmra.mxu1 %vm446_vm1, %v431_v33  ;;  %1965 = vmatprep.mubr.msk.bf16.mxu0 %vm446_vm1, %v424_v34  ;;  %v2739_v42 = vld [vmem:[%s2538_s9] sm:$0xff]  ;;  %v2750_v53 = vld [vmem:[%s2538_s9 + $0x30] sm:$0xff] }
  0x6e   : > { %1981 = vmatprep.mubr.msk.bf16.mxu1 %vm446_vm1, %v432_v35  ;;  %vm1271_vm3 = vcmp.gt.f32.partialorder %v2739_v42, 0.0  ;;  %v2757_v57 = vld [vmem:[%s2538_s9 + $0x20] sm:$0xff]  ;;  %vm1277_vm9 = vcmp.gt.f32.partialorder %v2750_v53, 0.0 }
  0x6f   : > { %vm1275_vm12 = vcmp.gt.f32.partialorder %v2757_v57, 0.0 }
  0x74   : > { %1966 = vmatmul.mubr.msk.bf16.gmra.mxu0 %vm446_vm1, %v425_v44 }
  0x75   : > { %1982 = vmatmul.mubr.msk.bf16.gmra.mxu1 %vm446_vm1, %v433_v45  ;;  %1969 = vmatprep.mubr.msk.bf16.mxu0 %vm446_vm1, %v426_v46 }
  0x76   : > { %1985 = vmatprep.mubr.msk.bf16.mxu1 %vm446_vm1, %v434_v47 }
  0x7c   : > { %1970 = vmatmul.mubr.msk.bf16.gmra.mxu0 %vm446_vm1, %v427_v54 }
  0x7d   : > { %1986 = vmatmul.mubr.msk.bf16.gmra.mxu1 %vm446_vm1, %v437_v55  ;;  %2025 = vmatprep.mubr.msk.bf16.mxu0 %vm446_vm1, %v2566_v10 }
  0x7e   : > { %1991 = vmatprep.mubr.msk.bf16.mxu1 %vm446_vm1, %v419_v56 }
  0x84   : > { %2026 = vmatmul.mubr.msk.bf16.vlgmr.msra.gmra.mxu0 %vm446_vm1, %v422_v22 }
  0x85   : > { %1992 = vmatmul.mubr.msk.bf16.vlgmr.msra.gmra.mxu1 %vm446_vm1, %v2559_v5  ;;  %2029 = vmatprep.mubr.msk.bf16.mxu0 %vm446_vm1, %v423_v32 }
  0x86   : > { %1995 = vmatprep.mubr.msk.bf16.mxu1 %vm446_vm1, %v2566_v10 }
  0x8c   : > { %2030 = vmatmul.mubr.msk.bf16.gmra.mxu0 %vm446_vm1, %v424_v34 }
  0x8d   : > { %1996 = vmatmul.mubr.msk.bf16.gmra.mxu1 %vm446_vm1, %v422_v22  ;;  %2033 = vmatprep.mubr.msk.bf16.mxu0 %vm446_vm1, %v425_v44 }
  0x8e   : > { %1999 = vmatprep.mubr.msk.bf16.mxu1 %vm446_vm1, %v423_v32 }
  0x94   : > { %2034 = vmatmul.mubr.msk.bf16.gmra.mxu0 %vm446_vm1, %v426_v46 }
  0x95   : > { %2000 = vmatmul.mubr.msk.bf16.gmra.mxu1 %vm446_vm1, %v424_v34  ;;  %2037 = vmatprep.mubr.msk.bf16.mxu0 %vm446_vm1, %v427_v54 }
  0x96   : > { %2003 = vmatprep.mubr.msk.bf16.mxu1 %vm446_vm1, %v425_v44  ;;  %v2742_v44 = vld [vmem:[%s2538_s9 + $0x18] sm:$0xff] }
  0x97   : > { %vm1274_vm4 = vcmp.gt.f32.partialorder %v2742_v44, 0.0 }
  0x9c   : > { %2038 = vmatmul.mubr.msk.bf16.gmra.mxu0 %vm446_vm1, %v2564_v9 }
  0x9d   : > { %2004 = vmatmul.mubr.msk.bf16.gmra.mxu1 %vm446_vm1, %v426_v46  ;;  %2041 = vmatprep.mubr.msk.bf16.mxu0 %vm446_vm1, %v2572_v13  ;;  %v1079_v46 = vld [vmem:[%s2530_s23] sm:$0xff] }
  0x9e   : > { %2007 = vmatprep.mubr.msk.bf16.mxu1 %vm446_vm1, %v427_v54  ;;  %v1082_v54 = vld [vmem:[%s2530_s23 + $0x18] sm:$0xff] }
  0xa4   : > { %2042 = vmatmul.mubr.msk.bf16.gmra.mxu0 %vm446_vm1, %v2594_v23 }
  0xa5   : > { %2008 = vmatmul.mubr.msk.bf16.gmra.mxu1 %vm446_vm1, %v2564_v9  ;;  %2045 = vmatprep.mubr.msk.bf16.mxu0 %vm446_vm1, %v431_v33 }
  0xa6   : > { %2011 = vmatprep.mubr.msk.bf16.mxu1 %vm446_vm1, %v2572_v13 }
  0xac   : > { %2046 = vmatmul.mubr.msk.bf16.gmra.mxu0 %vm446_vm1, %v432_v35 }
  0xad   : > { %2012 = vmatmul.mubr.msk.bf16.gmra.mxu1 %vm446_vm1, %v2594_v23  ;;  %2049 = vmatprep.mubr.msk.bf16.mxu0 %vm446_vm1, %v433_v45 }
  0xae   : > { %2015 = vmatprep.mubr.msk.bf16.mxu1 %vm446_vm1, %v431_v33 }
  0xb4   : > { %2050 = vmatmul.mubr.msk.bf16.gmra.mxu0 %vm446_vm1, %v434_v47 }
  0xb5   : > { %2016 = vmatmul.mubr.msk.bf16.gmra.mxu1 %vm446_vm1, %v432_v35  ;;  %2053 = vmatprep.mubr.msk.bf16.mxu0 %vm446_vm1, %v437_v55  ;;  %v1241_v35 = vld [vmem:[%s2538_s9 + $0x10] sm:$0xff] }
  0xb6   : > { %2019 = vmatprep.mubr.msk.bf16.mxu1 %vm446_vm1, %v433_v45  ;;  %v2745_v45 = vld [vmem:[%s2538_s9 + $0x8] sm:$0xff]  ;;  %vm1273_vm2 = vcmp.gt.f32.partialorder %v1241_v35, 0.0 }
  0xb7   : > { %vm1272_vm5 = vcmp.gt.f32.partialorder %v2745_v45, 0.0 }
  0xbc   : > { %2054 = vmatmul.mubr.msk.bf16.gmra.mxu0 %vm446_vm1, %v832_v59 }
  0xbd   : > { %2020 = vmatmul.mubr.msk.bf16.gmra.mxu1 %vm446_vm1, %v434_v47 }
 0x124   : > { %v1959_v60 = vpop.f32.mrf.mxu0 }
 0x125   : > { %v2674_v61 = vpop.f32.mrf.mxu1 }
 0x126   : > { %v533_v62 = vpop.f32.mrf.mxu0 }
 0x127   : > { %v2676_v63 = vpop.f32.mrf.mxu1 }
 0x128   : > { %v1960_v0 = vpop.f32.mrf.mxu0 }
 0x129   : > { %v2678_v1 = vpop.f32.mrf.mxu1 }
 0x12a   : > { %v536_v2 = vpop.f32.mrf.mxu0 }
 0x12b   : > { %v2680_v3 = vpop.f32.mrf.mxu1 }
 0x12c   : > { %v2682_v4 = vpop.f32.mrf.mxu0 }
 0x12d   : > { %v2684_v5 = vpop.f32.mrf.mxu1 }
 0x12e   : > { %v2686_v6 = vpop.f32.mrf.mxu0 }
 0x12f   : > { %v2688_v7 = vpop.f32.mrf.mxu1 }
 0x130   : > { %v2690_v8 = vpop.f32.mrf.mxu0 }
 0x131   : > { %v2692_v9 = vpop.f32.mrf.mxu1 }
 0x132   : > { %v2694_v10 = vpop.f32.mrf.mxu0 }
 0x133   : > { %v2696_v11 = vpop.f32.mrf.mxu1 }
 0x134   : > { %v2698_v12 = vpop.f32.mrf.mxu0 }
 0x135   : > { %v2700_v13 = vpop.f32.mrf.mxu1 }
 0x136   : > { %v2702_v14 = vpop.f32.mrf.mxu0 }
 0x137   : > { %v2704_v15 = vpop.f32.mrf.mxu1 }
 0x138   : > { %v2706_v16 = vpop.f32.mrf.mxu0 }
 0x139   : > { %v2708_v17 = vpop.f32.mrf.mxu1 }
 0x13a   : > { %v2710_v18 = vpop.f32.mrf.mxu0 }
 0x13b   : > { %v2712_v19 = vpop.f32.mrf.mxu1 }
 0x13c   : > { %v2714_v20 = vpop.f32.mrf.mxu0 }
 0x13d   : > { %v2716_v21 = vpop.f32.mrf.mxu1 }
 0x13e   : > { %v2718_v22 = vpop.f32.mrf.mxu0 }
 0x13f   : > { %v2720_v23 = vpop.f32.mrf.mxu1 }
 0x140   : > { %v2722_v24 = vpop.f32.mrf.mxu0 }
 0x141   : > { %v2724_v25 = vpop.f32.mrf.mxu1 }
 0x142   : > { %v2726_v26 = vpop.f32.mrf.mxu0 }
 0x143   : > { %v2728_v27 = vpop.f32.mrf.mxu1 }
 0x144   : > { %v2027_v29 = vpop.f32.mrf.mxu0 }
 0x145   : > { %v1993_v28 = vpop.f32.mrf.mxu1 }
 0x146   : > { %v714_v30 = vadd.f32 %v1993_v28, %v1959_v60  ;;  %v881_v33 = vpop.f32.mrf.mxu0  ;;  %v2319_v60 = vmov 0.0  }
 0x147   : > { %v705_v32 = vpop.f32.mrf.mxu1 }
 0x148   : > { %v1010_v34 = vadd.f32 %v2027_v29, %v714_v30  ;;  %v706_v36 = vadd.f32 %v705_v32, %v533_v62  ;;  %v2028_v39 = vpop.f32.mrf.mxu0 }
 0x149   : > { %v1994_v38 = vpop.f32.mrf.mxu1 }
 0x14a   : > { %v1049_v40 = vadd.f32 %v2733_v31, %v1010_v34  ;;  %v1008_v41 = vadd.f32 %v881_v33, %v706_v36  ;;  %v717_v43 = vadd.f32 %v1994_v38, %v1960_v0  ;;  %v884_v48 = vpop.f32.mrf.mxu0  ;;  %v1080_v36 = vld [vmem:[%s2530_s23 + $0x8] sm:$0xff] }
 0x14b   : > { %v708_v47 = vpop.f32.mrf.mxu1 }
 0x14c   : > { %v1113_v49 = vadd.f32 %v1081_v37, %v1049_v40  ;;  %v1047_v50 = vadd.f32 %v2733_v31, %v1008_v41  ;;  %v1011_v51 = vadd.f32 %v2028_v39, %v717_v43  ;;  %v709_v52 = vadd.f32 %v708_v47, %v536_v2  ;;  %v2031_v56 = vpop.f32.mrf.mxu0  ;;  %v2774_v40 = vld [vmem:[%s2538_s9 + $0x38] sm:$0xff] }
 0x14d   : > { %v1997_v55 = vpop.f32.mrf.mxu1  ;;  %vm1278_vm1 = vcmp.gt.f32.partialorder %v2774_v40, 0.0 }
 0x14e   : > { %vm1145_vm6 = vcmp.ge.f32.partialorder %v1113_v49, 1.0  ;;  %vm1209_vm7 = vcmp.le.f32.partialorder %v1113_v49, -1.0  ;;  %v1111_v58 = vadd.f32 %v1079_v46, %v1047_v50  ;;  %v1050_v59 = vadd.f32 %v2733_v31, %v1011_v51  ;;  %v897_v29 = vpop.f32.mrf.mxu0  ;;  %v1085_v51 = vld [vmem:[%s2530_s23 + $0x30] sm:$0xff] }
 0x14f   : > { %v1177_v62 = vsel %vm1145_vm6, 1.0, %v2319_v60  ;;  %vm1305_vm8 = vmand %vm1209_vm7, %vm1273_vm2  ;;  %v1009_v0 = vadd.f32 %v884_v48, %v709_v52  ;;  %v730_v2 = vadd.f32 %v1997_v55, %v2682_v4  ;;  %v721_v28 = vpop.f32.mrf.mxu1 }
 0x150   : > { %v1337_v30 = vsel %vm1305_vm8, -1.0, %v2319_v60  ;;  %vm1143_vm10 = vcmp.ge.f32.partialorder %v1111_v58, 1.0  ;;  %vm1207_vm11 = vcmp.le.f32.partialorder %v1111_v58, -1.0  ;;  %v2765_v32 = vadd.f32 %v1082_v54, %v1050_v59  ;;  %v2032_v39 = vpop.f32.mrf.mxu0 }
 0x151   : > { %v1369_v33 = vadd.f32 %v1337_v30, %v1177_v62  ;;  %v1175_v34 = vsel %vm1143_vm10, 1.0, %v2319_v60  ;;  %vm1303_vm13 = vmand %vm1207_vm11, %vm1271_vm3  ;;  %v1048_v4 = vadd.f32 %v2733_v31, %v1009_v0  ;;  %v1014_v37 = vadd.f32 %v2031_v56, %v730_v2  ;;  %v1998_v38 = vpop.f32.mrf.mxu1  ;;  %v1083_v0 = vld [vmem:[%s2530_s23 + $0x20] sm:$0xff] }
 0x152   : > { %v1335_v41 = vsel %vm1303_vm13, -1.0, %v2319_v60  ;;  %vm1146_vm14 = vcmp.ge.f32.partialorder %v2765_v32, 1.0  ;;  %vm1210_vm15 = vcmp.le.f32.partialorder %v2765_v32, -1.0  ;;  %v722_v43 = vadd.f32 %v721_v28, %v2686_v6  ;;  %v2788_v54 = vpop.f32.mrf.mxu0  ;;  %v2808_v28 = vld [vmem:[%s2538_s9 + $0x28] sm:$0xff] }
 0x153   : > { %1401 = vst [vmem:[%s2781_s18 + $0x10] sm:$0xff] %v1369_v33  ;;  %v1433_v46 = vsub.f32 %v1113_v49, %v1369_v33  ;;  %v1529_v47 = vadd.f32 %v1369_v33, %v1241_v35  ;;  %v1367_v48 = vadd.f32 %v1335_v41, %v1175_v34  ;;  %v1178_v50 = vsel %vm1146_vm14, 1.0, %v2319_v60  ;;  %vm1306_vm0 = vmand %vm1210_vm15, %vm1274_vm4  ;;  %v724_v52 = vpop.f32.mrf.mxu1 }
 0x154   : > { %v1338_v6 = vsel %vm1306_vm0, -1.0, %v2319_v60  ;;  %v2791_v55 = vadd.f32 %v1080_v36, %v1048_v4  ;;  %v1053_v49 = vadd.f32 %v2733_v31, %v1014_v37  ;;  %v1012_v35 = vadd.f32 %v897_v29, %v722_v43  ;;  %v2035_v30 = vpop.f32.mrf.mxu0  ;;  %v2816_v4 = vld [vmem:[%s2538_s9 + $0x50] sm:$0xff] }
 0x155   : > { %1465 = vst [vmem:[%s2796_s20 + $0x10] sm:$0xff] %v1433_v46  ;;  %1561 = vst [vmem:[%s2800_s21 + $0x10] sm:$0xff] %v1529_v47  ;;  %v1431_v56 = vsub.f32 %v1111_v58, %v1367_v48  ;;  %v1527_v59 = vadd.f32 %v1367_v48, %v2739_v42  ;;  %v1370_v62 = vadd.f32 %v1338_v6, %v1178_v50  ;;  %v2001_v29 = vpop.f32.mrf.mxu1  ;;  %vm1276_vm8 = vcmp.gt.f32.partialorder %v2808_v28, 0.0  ;;  %v1086_v46 = vld [vmem:[%s2530_s23 + $0x38] sm:$0xff] }
 0x156   : > { %1399 = vst [vmem:[%s2781_s18] sm:$0xff] %v1367_v48  ;;  %v733_v2 = vadd.f32 %v1998_v38, %v2690_v8  ;;  %vm1144_vm2 = vcmp.ge.f32.partialorder %v2791_v55, 1.0  ;;  %vm1208_vm3 = vcmp.le.f32.partialorder %v2791_v55, -1.0  ;;  %v2812_v33 = vadd.f32 %v1085_v51, %v1053_v49  ;;  %v913_v38 = vpop.f32.mrf.mxu0  ;;  %v2842_v48 = vld [vmem:[%s2538_s9 + $0x40] sm:$0xff] }
 0x157   : > { %v1051_v34 = vadd.f32 %v2733_v31, %v1012_v35  ;;  %1463 = vst [vmem:[%s2796_s20] sm:$0xff] %v1431_v56  ;;  %1559 = vst [vmem:[%s2800_s21] sm:$0xff] %v1527_v59  ;;  %v1434_v8 = vsub.f32 %v2765_v32, %v1370_v62  ;;  %v1530_v42 = vadd.f32 %v1370_v62, %v2742_v44  ;;  %v1176_v58 = vsel %vm1144_vm2, 1.0, %v2319_v60  ;;  %v737_v37 = vpop.f32.mrf.mxu1 }
 0x158   : > { %1402 = vst [vmem:[%s2781_s18 + $0x18] sm:$0xff] %v1370_v62  ;;  %vm1304_vm4 = vmand %vm1208_vm3, %vm1272_vm5  ;;  %v1015_v36 = vadd.f32 %v2032_v39, %v733_v2  ;;  %vm1149_vm6 = vcmp.ge.f32.partialorder %v2812_v33, 1.0  ;;  %vm1213_vm7 = vcmp.le.f32.partialorder %v2812_v33, -1.0  ;;  %v725_v47 = vadd.f32 %v724_v52, %v2694_v10  ;;  %v2844_v51 = vpop.f32.mrf.mxu0 }
 0x159   : > { %v1336_v41 = vsel %vm1304_vm4, -1.0, %v2319_v60  ;;  %v2829_v43 = vadd.f32 %v1083_v0, %v1051_v34  ;;  %1466 = vst [vmem:[%s2796_s20 + $0x18] sm:$0xff] %v1434_v8  ;;  %1562 = vst [vmem:[%s2800_s21 + $0x18] sm:$0xff] %v1530_v42  ;;  %v1181_v32 = vsel %vm1149_vm6, 1.0, %v2319_v60  ;;  %vm1281_vm10 = vcmp.gt.f32.partialorder %v2816_v4, 0.0  ;;  %v2002_v50 = vpop.f32.mrf.mxu1  ;;  %v1084_v8 = vld [vmem:[%s2530_s23 + $0x28] sm:$0xff] }
 0x15a   : > { %v1368_v44 = vadd.f32 %v1336_v41, %v1176_v58  ;;  %vm1309_vm5 = vmand %vm1213_vm7, %vm1277_vm9  ;;  %v1054_v39 = vadd.f32 %v2733_v31, %v1015_v36  ;;  %v746_v49 = vadd.f32 %v2001_v29, %v2698_v12  ;;  %v2856_v62 = vpop.f32.mrf.mxu0  ;;  %vm1279_vm14 = vcmp.gt.f32.partialorder %v2842_v48, 0.0  ;;  %v1089_v42 = vld [vmem:[%s2530_s23 + $0x50] sm:$0xff] }
 0x15b   : > { %v1341_v6 = vsel %vm1309_vm5, -1.0, %v2319_v60  ;;  %vm1147_vm11 = vcmp.ge.f32.partialorder %v2829_v43, 1.0  ;;  %vm1211_vm13 = vcmp.le.f32.partialorder %v2829_v43, -1.0  ;;  %v740_v59 = vpop.f32.mrf.mxu1  ;;  %v738_v58 = vadd.f32 %v737_v37, %v2702_v14 }
 0x15c   : > { %1400 = vst [vmem:[%s2781_s18 + $0x8] sm:$0xff] %v1368_v44  ;;  %v1432_v10 = vsub.f32 %v2791_v55, %v1368_v44  ;;  %v1528_v52 = vadd.f32 %v1368_v44, %v2745_v45  ;;  %v1373_v35 = vadd.f32 %v1341_v6, %v1181_v32  ;;  %v1179_v56 = vsel %vm1147_vm11, 1.0, %v2319_v60  ;;  %vm1307_vm9 = vmand %vm1211_vm13, %vm1275_vm12  ;;  %v2039_v36 = vpop.f32.mrf.mxu0  ;;  %v2887_v32 = vld [vmem:[%s2538_s9 + $0x48] sm:$0xff] }
 0x15d   : > { %v1339_v12 = vsel %vm1307_vm9, -1.0, %v2319_v60  ;;  %v2859_v0 = vadd.f32 %v1086_v46, %v1054_v39  ;;  %v1013_v55 = vadd.f32 %v2788_v54, %v725_v47  ;;  %v1018_v2 = vadd.f32 %v2035_v30, %v746_v49  ;;  %v2872_v54 = vld [vmem:[%s2538_s9 + $0x58] sm:$0xff]  ;;  %v2005_v30 = vpop.f32.mrf.mxu1 }
 0x15e   : > { %1464 = vst [vmem:[%s2796_s20 + $0x8] sm:$0xff] %v1432_v10  ;;  %1560 = vst [vmem:[%s2800_s21 + $0x8] sm:$0xff] %v1528_v52  ;;  %v1437_v45 = vsub.f32 %v2812_v33, %v1373_v35  ;;  %v1533_v29 = vadd.f32 %v1373_v35, %v2750_v53  ;;  %v1371_v34 = vadd.f32 %v1339_v12, %v1179_v56  ;;  %v2889_v46 = vpop.f32.mrf.mxu0  ;;  %vm1282_vm2 = vcmp.gt.f32.partialorder %v2872_v54, 0.0  ;;  %v1087_v10 = vld [vmem:[%s2530_s23 + $0x40] sm:$0xff]  ;;  %v2905_v56 = vld [vmem:[%s2538_s9 + $0x70] sm:$0xff] }
 0x15f   : > { %1405 = vst [vmem:[%s2781_s18 + $0x30] sm:$0xff] %v1373_v35  ;;  %vm1150_vm12 = vcmp.ge.f32.partialorder %v2859_v0, 1.0  ;;  %vm1214_vm15 = vcmp.le.f32.partialorder %v2859_v0, -1.0  ;;  %v1052_v41 = vadd.f32 %v2733_v31, %v1013_v55  ;;  %v1057_v33 = vadd.f32 %v2733_v31, %v1018_v2  ;;  %v753_v39 = vpop.f32.mrf.mxu1 }
 0x160   : > { %1469 = vst [vmem:[%s2796_s20 + $0x30] sm:$0xff] %v1437_v45  ;;  %1565 = vst [vmem:[%s2800_s21 + $0x30] sm:$0xff] %v1533_v29  ;;  %v1435_v14 = vsub.f32 %v2829_v43, %v1371_v34  ;;  %v1531_v53 = vadd.f32 %v1371_v34, %v2757_v57  ;;  %v1182_v37 = vsel %vm1150_vm12, 1.0, %v2319_v60  ;;  %v1016_v44 = vadd.f32 %v913_v38, %v738_v58  ;;  %v2909_v55 = vpop.f32.mrf.mxu0 }
 0x161   : > { %1403 = vst [vmem:[%s2781_s18 + $0x20] sm:$0xff] %v1371_v34  ;;  %vm1310_vm0 = vmand %vm1214_vm15, %vm1278_vm1  ;;  %v2892_v6 = vadd.f32 %v1084_v8, %v1052_v41  ;;  %v2894_v43 = vadd.f32 %v1089_v42, %v1057_v33  ;;  %v749_v57 = vadd.f32 %v2002_v50, %v2706_v16  ;;  %v741_v52 = vadd.f32 %v740_v59, %v2710_v18  ;;  %v2907_v12 = vpop.f32.mrf.mxu1  ;;  %v1090_v42 = vld [vmem:[%s2530_s23 + $0x58] sm:$0xff]  ;;  %v2939_v41 = vld [vmem:[%s2538_s9 + $0x60] sm:$0xff] }
 0x162   : > { %v1342_v47 = vsel %vm1310_vm0, -1.0, %v2319_v60  ;;  %1467 = vst [vmem:[%s2796_s20 + $0x20] sm:$0xff] %v1435_v14  ;;  %1563 = vst [vmem:[%s2800_s21 + $0x20] sm:$0xff] %v1531_v53  ;;  %v1055_v49 = vadd.f32 %v2733_v31, %v1016_v44  ;;  %v762_v35 = vadd.f32 %v2005_v30, %v2714_v20  ;;  %vm1280_vm7 = vcmp.gt.f32.partialorder %v2887_v32, 0.0  ;;  %v2923_v2 = vpop.f32.mrf.mxu0  ;;  %v1088_v53 = vld [vmem:[%s2530_s23 + $0x48] sm:$0xff] }
 0x163   : > { %v1374_v38 = vadd.f32 %v1342_v47, %v1182_v37  ;;  %vm1148_vm1 = vcmp.ge.f32.partialorder %v2892_v6, 1.0  ;;  %vm1212_vm3 = vcmp.le.f32.partialorder %v2892_v6, -1.0  ;;  %vm1153_vm4 = vcmp.ge.f32.partialorder %v2894_v43, 1.0  ;;  %v756_v59 = vpop.f32.mrf.mxu1 }
 0x164   : > { %vm1217_vm6 = vcmp.le.f32.partialorder %v2894_v43, -1.0  ;;  %v1180_v20 = vsel %vm1148_vm1, 1.0, %v2319_v60  ;;  %vm1308_vm5 = vmand %vm1212_vm3, %vm1276_vm8  ;;  %v1185_v50 = vsel %vm1153_vm4, 1.0, %v2319_v60  ;;  %v1017_v29 = vadd.f32 %v2856_v62, %v741_v52 }
 0x165   : > { %1406 = vst [vmem:[%s2781_s18 + $0x38] sm:$0xff] %v1374_v38  ;;  %v1438_v16 = vsub.f32 %v2859_v0, %v1374_v38  ;;  %v1534_v18 = vadd.f32 %v1374_v38, %v2774_v40  ;;  %v1340_v45 = vsel %vm1308_vm5, -1.0, %v2319_v60  ;;  %vm1313_vm11 = vmand %vm1217_vm6, %vm1281_vm10  ;;  %v2928_v0 = vadd.f32 %v1087_v10, %v1055_v49  ;;  %v2941_v33 = vpop.f32.mrf.mxu1  ;;  %v2969_v10 = vld [vmem:[%s2538_s9 + $0x68] sm:$0xff] }
 0x166   : > { %v1019_v40 = vadd.f32 %v2844_v51, %v749_v57  ;;  %vm1285_vm8 = vcmp.gt.f32.partialorder %v2905_v56, 0.0  ;;  %v1372_v34 = vadd.f32 %v1340_v45, %v1180_v20  ;;  %v1345_v8 = vsel %vm1313_vm11, -1.0, %v2319_v60  ;;  %v2943_v51 = vpop.f32.mrf.mxu0 }
 0x167   : > { %1470 = vst [vmem:[%s2796_s20 + $0x38] sm:$0xff] %v1438_v16  ;;  %1566 = vst [vmem:[%s2800_s21 + $0x38] sm:$0xff] %v1534_v18  ;;  %v1022_v58 = vadd.f32 %v2039_v36, %v762_v35  ;;  %v754_v30 = vadd.f32 %v753_v39, %v2718_v22  ;;  %v1377_v62 = vadd.f32 %v1345_v8, %v1185_v50  ;;  %vm1151_vm10 = vcmp.ge.f32.partialorder %v2928_v0, 1.0  ;;  %v2957_v39 = vld [vmem:[%s2538_s9 + $0x78] sm:$0xff]  ;;  %v2959_v47 = vpop.f32.mrf.mxu1  ;;  %v1093_v18 = vld [vmem:[%s2530_s23 + $0x70] sm:$0xff] }
 0x168   : > { %vm1215_vm13 = vcmp.le.f32.partialorder %v2928_v0, -1.0  ;;  %v1058_v14 = vadd.f32 %v2733_v31, %v1019_v40  ;;  %1404 = vst [vmem:[%s2781_s18 + $0x28] sm:$0xff] %v1372_v34  ;;  %v1436_v22 = vsub.f32 %v2892_v6, %v1372_v34  ;;  %v1532_v36 = vadd.f32 %v1372_v34, %v2808_v28  ;;  %v2961_v57 = vpop.f32.mrf.mxu0 }
 0x169   : > { %v1183_v37 = vsel %vm1151_vm10, 1.0, %v2319_v60  ;;  %vm1311_vm9 = vmand %vm1215_vm13, %vm1279_vm14  ;;  %v1056_v44 = vadd.f32 %v2733_v31, %v1017_v29  ;;  %1409 = vst [vmem:[%s2781_s18 + $0x50] sm:$0xff] %v1377_v62  ;;  %v1441_v6 = vsub.f32 %v2894_v43, %v1377_v62  ;;  %v1537_v28 = vadd.f32 %v1377_v62, %v2816_v4  ;;  %v2978_v20 = vpop.f32.mrf.mxu1 }
 0x16a   : > { %v1343_v38 = vsel %vm1311_vm9, -1.0, %v2319_v60  ;;  %v1122_v49 = vadd.f32 %v1090_v42, %v1058_v14  ;;  %vm1283_vm14 = vcmp.gt.f32.partialorder %v2939_v41, 0.0  ;;  %1468 = vst [vmem:[%s2796_s20 + $0x28] sm:$0xff] %v1436_v22  ;;  %1564 = vst [vmem:[%s2800_s21 + $0x28] sm:$0xff] %v1532_v36  ;;  %v1061_v16 = vadd.f32 %v2733_v31, %v1022_v58  ;;  %v2980_v4 = vpop.f32.mrf.mxu0  ;;  %v1091_v42 = vld [vmem:[%s2530_s23 + $0x60] sm:$0xff] }
 0x16b   : > { %v1375_v52 = vadd.f32 %v1343_v38, %v1183_v37  ;;  %v2973_v35 = vadd.f32 %v1088_v53, %v1056_v44  ;;  %v1020_v43 = vadd.f32 %v2889_v46, %v754_v30  ;;  %1473 = vst [vmem:[%s2796_s20 + $0x50] sm:$0xff] %v1441_v6  ;;  %1569 = vst [vmem:[%s2800_s21 + $0x50] sm:$0xff] %v1537_v28  ;;  %vm1286_vm0 = vcmp.gt.f32.partialorder %v2957_v39, 0.0  ;;  %v1094_v44 = vld [vmem:[%s2530_s23 + $0x78] sm:$0xff] }
 0x16c   : > { %vm1154_vm12 = vcmp.ge.f32.partialorder %v1122_v49, 1.0  ;;  %vm1218_vm15 = vcmp.le.f32.partialorder %v1122_v49, -1.0  ;;  %v765_v50 = vadd.f32 %v2907_v12, %v2722_v24  ;;  %v757_v45 = vadd.f32 %v756_v59, %v2726_v26  ;;  %v2997_v24 = vld [vmem:[%s2538_s9 + $0x90] sm:$0xff]  ;;  %v2999_v12 = vpop.f32.mrf.mxu1  ;;  %v3001_v26 = vpop.f32.mrf.mxu0 }
 0x16d   : > { %1407 = vst [vmem:[%s2781_s18 + $0x40] sm:$0xff] %v1375_v52  ;;  %v1439_v46 = vsub.f32 %v2928_v0, %v1375_v52  ;;  %v1535_v40 = vadd.f32 %v1375_v52, %v2842_v48  ;;  %v1186_v29 = vsel %vm1154_vm12, 1.0, %v2319_v60  ;;  %vm1314_vm1 = vmand %vm1218_vm15, %vm1282_vm2  ;;  %vm1152_vm3 = vcmp.ge.f32.partialorder %v2973_v35, 1.0 }
 0x16e   : > { %vm1284_vm4 = vcmp.gt.f32.partialorder %v2969_v10, 0.0  ;;  %v1346_v59 = vsel %vm1314_vm1, -1.0, %v2319_v60  ;;  %v1184_v48 = vsel %vm1152_vm3, 1.0, %v2319_v60  ;;  %vm1216_vm6 = vcmp.le.f32.partialorder %v2973_v35, -1.0  ;;  %v3014_v62 = vpop.f32.mrf.mxu1  ;;  %v3020_v22 = vpop.f32.mrf.mxu0 }
 0x16f   : > { %v1125_v0 = vadd.f32 %v1093_v18, %v1061_v16  ;;  %1471 = vst [vmem:[%s2796_s20 + $0x40] sm:$0xff] %v1439_v46  ;;  %1567 = vst [vmem:[%s2800_s21 + $0x40] sm:$0xff] %v1535_v40  ;;  %v1378_v34 = vadd.f32 %v1346_v59, %v1186_v29  ;;  %v1059_v8 = vadd.f32 %v2733_v31, %v1020_v43  ;;  %v3041_v43 = vld [vmem:[%s2538_s9 + $0x80] sm:$0xff]  ;;  %v3050_v40 = vld [vmem:[%s2538_s9 + $0x98] sm:$0xff] }
 0x170   : > { %vm1312_vm2 = vmand %vm1216_vm6, %vm1280_vm7  ;;  %v1023_v58 = vadd.f32 %v2909_v55, %v765_v50  ;;  %v1021_v30 = vadd.f32 %v2923_v2, %v757_v45  ;;  %v778_v53 = vadd.f32 %v2941_v33, %v2674_v61  ;;  %vm1289_vm7 = vcmp.gt.f32.partialorder %v2997_v24, 0.0  ;;  %v1092_v61 = vld [vmem:[%s2530_s23 + $0x68] sm:$0xff]  ;;  %v3029_v33 = vpop.f32.mrf.mxu1 }
 0x171   : > { %v1344_v14 = vsel %vm1312_vm2, -1.0, %v2319_v60  ;;  %vm1157_vm5 = vcmp.ge.f32.partialorder %v1125_v0, 1.0  ;;  %vm1221_vm11 = vcmp.le.f32.partialorder %v1125_v0, -1.0  ;;  %1410 = vst [vmem:[%s2781_s18 + $0x58] sm:$0xff] %v1378_v34  ;;  %v1442_v55 = vsub.f32 %v1122_v49, %v1378_v34 }
 0x172   : > { %v1538_v2 = vadd.f32 %v1378_v34, %v2872_v54  ;;  %v1376_v36 = vadd.f32 %v1344_v14, %v1184_v48  ;;  %v1189_v37 = vsel %vm1157_vm5, 1.0, %v2319_v60  ;;  %vm1317_vm10 = vmand %vm1221_vm11, %vm1285_vm8  ;;  %v1123_v28 = vadd.f32 %v1091_v42, %v1059_v8  ;;  %v3043_v50 = vpop.f32.mrf.mxu1  ;;  %v1097_v48 = vld [vmem:[%s2530_s23 + $0x90] sm:$0xff] }
 0x173   : > { %v1349_v6 = vsel %vm1317_vm10, -1.0, %v2319_v60  ;;  %v1062_v38 = vadd.f32 %v2733_v31, %v1023_v58  ;;  %v1060_v49 = vadd.f32 %v2733_v31, %v1021_v30  ;;  %1474 = vst [vmem:[%s2796_s20 + $0x58] sm:$0xff] %v1442_v55  ;;  %v1026_v18 = vadd.f32 %v2943_v51, %v778_v53  ;;  %v3084_v55 = vld [vmem:[%s2538_s9 + $0x88] sm:$0xff] }
 0x174   : > { %1570 = vst [vmem:[%s2800_s21 + $0x58] sm:$0xff] %v1538_v2  ;;  %1408 = vst [vmem:[%s2781_s18 + $0x48] sm:$0xff] %v1376_v36  ;;  %v1440_v54 = vsub.f32 %v2973_v35, %v1376_v36  ;;  %v1536_v52 = vadd.f32 %v1376_v36, %v2887_v32  ;;  %v1381_v16 = vadd.f32 %v1349_v6, %v1189_v37  ;;  %vm1155_vm8 = vcmp.ge.f32.partialorder %v1123_v28, 1.0  ;;  %v3052_v35 = vpop.f32.mrf.mxu0  ;;  %v788_v42 = vpop.f32.mrf.mxu1 }
 0x175   : > { %vm1219_vm13 = vcmp.le.f32.partialorder %v1123_v28, -1.0  ;;  %v3045_v45 = vadd.f32 %v1094_v44, %v1062_v38  ;;  %v3047_v46 = vadd.f32 %v1092_v61, %v1060_v49  ;;  %v1187_v29 = vsel %vm1155_vm8, 1.0, %v2319_v60  ;;  %v3107_v38 = vld [vmem:[%s2538_s9 + $0xa0] sm:$0xff] }
 0x176   : > { %1472 = vst [vmem:[%s2796_s20 + $0x48] sm:$0xff] %v1440_v54  ;;  %1568 = vst [vmem:[%s2800_s21 + $0x48] sm:$0xff] %v1536_v52  ;;  %v1445_v32 = vsub.f32 %v1125_v0, %v1381_v16  ;;  %v1541_v51 = vadd.f32 %v1381_v16, %v2905_v56  ;;  %v1065_v59 = vadd.f32 %v2733_v31, %v1026_v18  ;;  %vm1287_vm3 = vcmp.gt.f32.partialorder %v3041_v43, 0.0  ;;  %v3086_v2 = vpop.f32.mrf.mxu0  ;;  %v3109_v49 = vpop.f32.mrf.mxu1  ;;  %v1098_v18 = vld [vmem:[%s2530_s23 + $0x98] sm:$0xff] }
 0x177   : > { %1413 = vst [vmem:[%s2781_s18 + $0x70] sm:$0xff] %v1381_v16  ;;  %vm1315_vm9 = vmand %vm1219_vm13, %vm1283_vm14  ;;  %vm1158_vm12 = vcmp.ge.f32.partialorder %v3045_v45, 1.0  ;;  %vm1222_vm15 = vcmp.le.f32.partialorder %v3045_v45, -1.0  ;;  %vm1156_vm1 = vcmp.ge.f32.partialorder %v3047_v46, 1.0  ;;  %vm1220_vm6 = vcmp.le.f32.partialorder %v3047_v46, -1.0 }
 0x178   : > { %v1347_v34 = vsel %vm1315_vm9, -1.0, %v2319_v60  ;;  %1477 = vst [vmem:[%s2796_s20 + $0x70] sm:$0xff] %v1445_v32  ;;  %1573 = vst [vmem:[%s2800_s21 + $0x70] sm:$0xff] %v1541_v51  ;;  %v1190_v0 = vsel %vm1158_vm12, 1.0, %v2319_v60  ;;  %v1188_v8 = vsel %vm1156_vm1, 1.0, %v2319_v60  ;;  %vm1290_vm2 = vcmp.gt.f32.partialorder %v3050_v40, 0.0 }
 0x179   : > { %v1379_v56 = vadd.f32 %v1347_v34, %v1187_v29  ;;  %vm1318_vm14 = vmand %vm1222_vm15, %vm1286_vm0  ;;  %v1129_v30 = vadd.f32 %v1097_v48, %v1065_v59  ;;  %v770_v14 = vadd.f32 %v2959_v47, %v2676_v63  ;;  %v781_v53 = vadd.f32 %v2978_v20, %v2678_v1  ;;  %v3093_v1 = vld [vmem:[%s2538_s9 + $0xb0] sm:$0xff]  ;;  %v3136_v34 = vpop.f32.mrf.mxu1 }
 0x17a   : > { %v1350_v58 = vsel %vm1318_vm14, -1.0, %v2319_v60  ;;  %vm1316_vm5 = vmand %vm1220_vm6, %vm1284_vm4  ;;  %vm1288_vm10 = vcmp.gt.f32.partialorder %v3084_v55, 0.0  ;;  %v773_v51 = vadd.f32 %v2999_v12, %v2680_v3  ;;  %v786_v29 = vadd.f32 %v3029_v33, %v2688_v7  ;;  %v1096_v7 = vld [vmem:[%s2530_s23 + $0x88] sm:$0xff]  ;;  %v1101_v33 = vld [vmem:[%s2530_s23 + $0xb0] sm:$0xff] }
 0x17b   : > { %1411 = vst [vmem:[%s2781_s18 + $0x60] sm:$0xff] %v1379_v56  ;;  %v1443_v36 = vsub.f32 %v1123_v28, %v1379_v56  ;;  %v1539_v37 = vadd.f32 %v1379_v56, %v2939_v41  ;;  %v1382_v44 = vadd.f32 %v1350_v58, %v1190_v0  ;;  %v1348_v61 = vsel %vm1316_vm5, -1.0, %v2319_v60  ;;  %v1095_v28 = vld [vmem:[%s2530_s23 + $0x80] sm:$0xff] }
 0x17c   : > { %v1380_v6 = vadd.f32 %v1348_v61, %v1188_v8  ;;  %vm1161_vm0 = vcmp.ge.f32.partialorder %v1129_v30, 1.0  ;;  %vm1225_vm4 = vcmp.le.f32.partialorder %v1129_v30, -1.0  ;;  %v1024_v63 = vadd.f32 %v2961_v57, %v770_v14  ;;  %v1099_v0 = vld [vmem:[%s2530_s23 + $0xa0] sm:$0xff] }
 0x17d   : > { %1475 = vst [vmem:[%s2796_s20 + $0x60] sm:$0xff] %v1443_v36  ;;  %1571 = vst [vmem:[%s2800_s21 + $0x60] sm:$0xff] %v1539_v37  ;;  %v1446_v47 = vsub.f32 %v3045_v45, %v1382_v44  ;;  %v1542_v41 = vadd.f32 %v1382_v44, %v2957_v39  ;;  %v1193_v20 = vsel %vm1161_vm0, 1.0, %v2319_v60  ;;  %v1027_v57 = vadd.f32 %v2980_v4, %v781_v53  ;;  %v964_v4 = vpop.f32.mrf.mxu0  ;;  %v2018_v37 = vpop.f32.mrf.mxu1 }
 0x17e   : > { %1414 = vst [vmem:[%s2781_s18 + $0x78] sm:$0xff] %v1382_v44  ;;  %vm1321_vm11 = vmand %vm1225_vm4, %vm1289_vm7  ;;  %v1444_v39 = vsub.f32 %v3047_v46, %v1380_v6  ;;  %v1540_v54 = vadd.f32 %v1380_v6, %v2969_v10  ;;  %v1063_v16 = vadd.f32 %v2733_v31, %v1024_v63  ;;  %v794_v46 = vadd.f32 %v3014_v62, %v2684_v5 }
 0x17f   : > { %1412 = vst [vmem:[%s2781_s18 + $0x68] sm:$0xff] %v1380_v6  ;;  %v1353_v52 = vsel %vm1321_vm11, -1.0, %v2319_v60  ;;  %1478 = vst [vmem:[%s2796_s20 + $0x78] sm:$0xff] %v1446_v47  ;;  %v1066_v32 = vadd.f32 %v2733_v31, %v1027_v57  ;;  %vm1293_vm7 = vcmp.gt.f32.partialorder %v3093_v1, 0.0  ;;  %vm1291_vm8 = vcmp.gt.f32.partialorder %v3107_v38, 0.0  ;;  %v3145_v56 = vpop.f32.mrf.mxu0 }
 0x180   : > { %1574 = vst [vmem:[%s2800_s21 + $0x78] sm:$0xff] %v1542_v41  ;;  %v1385_v45 = vadd.f32 %v1353_v52, %v1193_v20  ;;  %1476 = vst [vmem:[%s2796_s20 + $0x68] sm:$0xff] %v1444_v39  ;;  %v1127_v10 = vadd.f32 %v1095_v28, %v1063_v16  ;;  %v797_v59 = vadd.f32 %v3043_v50, %v2692_v9  ;;  %v3143_v50 = vld [vmem:[%s2538_s9 + $0xb8] sm:$0xff]  ;;  %v3191_v52 = vpop.f32.mrf.mxu1 }
 0x181   : > { %1572 = vst [vmem:[%s2800_s21 + $0x68] sm:$0xff] %v1540_v54  ;;  %v789_v3 = vadd.f32 %v788_v42, %v2696_v11  ;;  %v1130_v62 = vadd.f32 %v1098_v18, %v1066_v32  ;;  %v1025_v48 = vadd.f32 %v3001_v26, %v773_v51  ;;  %v1030_v9 = vadd.f32 %v3020_v22, %v794_v46  ;;  %v3155_v22 = vld [vmem:[%s2538_s9 + $0xa8] sm:$0xff]  ;;  %v977_v47 = vpop.f32.mrf.mxu0 }
 0x182   : > { %1417 = vst [vmem:[%s2781_s18 + $0x90] sm:$0xff] %v1385_v45  ;;  %v1449_v5 = vsub.f32 %v1129_v30, %v1385_v45  ;;  %v1545_v12 = vadd.f32 %v1385_v45, %v2997_v24  ;;  %vm1159_vm13 = vcmp.ge.f32.partialorder %v1127_v10, 1.0  ;;  %vm1223_vm9 = vcmp.le.f32.partialorder %v1127_v10, -1.0  ;;  %v1102_v45 = vld [vmem:[%s2530_s23 + $0xb8] sm:$0xff]  ;;  %v1100_v32 = vld [vmem:[%s2530_s23 + $0xa8] sm:$0xff] }
 0x183   : > { %v1028_v11 = vadd.f32 %v3052_v35, %v786_v29  ;;  %v1191_v24 = vsel %vm1159_vm13, 1.0, %v2319_v60  ;;  %vm1319_vm12 = vmand %vm1223_vm9, %vm1287_vm3  ;;  %vm1162_vm15 = vcmp.ge.f32.partialorder %v1130_v62, 1.0  ;;  %vm1226_vm1 = vcmp.le.f32.partialorder %v1130_v62, -1.0  ;;  %v2052_v51 = vpop.f32.mrf.mxu0 }
 0x184   : > { %1481 = vst [vmem:[%s2796_s20 + $0x90] sm:$0xff] %v1449_v5  ;;  %1577 = vst [vmem:[%s2800_s21 + $0x90] sm:$0xff] %v1545_v12  ;;  %v1064_v26 = vadd.f32 %v2733_v31, %v1025_v48  ;;  %v1351_v35 = vsel %vm1319_vm12, -1.0, %v2319_v60  ;;  %v1194_v8 = vsel %vm1162_vm15, 1.0, %v2319_v60  ;;  %v1069_v42 = vadd.f32 %v2733_v31, %v1030_v9 }
 0x185   : > { %vm1322_vm14 = vmand %vm1226_vm1, %vm1290_vm2  ;;  %v1067_v58 = vadd.f32 %v2733_v31, %v1028_v11  ;;  %v1383_v30 = vadd.f32 %v1351_v35, %v1191_v24  ;;  %v1031_v36 = vadd.f32 %v3086_v2, %v797_v59  ;;  %vm1294_vm3 = vcmp.gt.f32.partialorder %v3143_v50, 0.0  ;;  %v3174_v2 = vld [vmem:[%s2538_s9 + $0xd0] sm:$0xff]  ;;  %v980_v24 = vpop.f32.mrf.mxu0  ;;  %v1103_v35 = vld [vmem:[%s2530_s23 + $0xc0] sm:$0xff] }
 0x186   : > { %v1354_v14 = vsel %vm1322_vm14, -1.0, %v2319_v60  ;;  %v1128_v53 = vadd.f32 %v1096_v7, %v1064_v26  ;;  %v3166_v61 = vadd.f32 %v1101_v33, %v1069_v42  ;;  %v1029_v63 = vadd.f32 %v964_v4, %v789_v3  ;;  %v3212_v3 = vld [vmem:[%s2538_s9 + $0xd8] sm:$0xff] }
 0x187   : > { %v1386_v44 = vadd.f32 %v1354_v14, %v1194_v8  ;;  %v3168_v6 = vadd.f32 %v1099_v0, %v1067_v58  ;;  %vm1292_vm6 = vcmp.gt.f32.partialorder %v3155_v22, 0.0  ;;  %1415 = vst [vmem:[%s2781_s18 + $0x80] sm:$0xff] %v1383_v30  ;;  %v1447_v41 = vsub.f32 %v1127_v10, %v1383_v30  ;;  %v1105_v0 = vld [vmem:[%s2530_s23 + $0xd0] sm:$0xff] }
 0x188   : > { %v1543_v20 = vadd.f32 %v1383_v30, %v3041_v43  ;;  %vm1160_vm2 = vcmp.ge.f32.partialorder %v1128_v53, 1.0  ;;  %vm1224_vm5 = vcmp.le.f32.partialorder %v1128_v53, -1.0  ;;  %vm1165_vm4 = vcmp.ge.f32.partialorder %v3166_v61, 1.0  ;;  %v3249_v30 = vld [vmem:[%s2538_s9 + $0xc8] sm:$0xff] }
 0x189   : > { %1418 = vst [vmem:[%s2781_s18 + $0x98] sm:$0xff] %v1386_v44  ;;  %v1450_v28 = vsub.f32 %v1130_v62, %v1386_v44  ;;  %v1546_v57 = vadd.f32 %v1386_v44, %v3050_v40  ;;  %v1192_v39 = vsel %vm1160_vm2, 1.0, %v2319_v60  ;;  %vm1320_vm0 = vmand %vm1224_vm5, %vm1288_vm10  ;;  %v1197_v54 = vsel %vm1165_vm4, 1.0, %v2319_v60  ;;  %v3189_v40 = vld [vmem:[%s2538_s9 + $0xc0] sm:$0xff] }
 0x18a   : > { %1479 = vst [vmem:[%s2796_s20 + $0x80] sm:$0xff] %v1447_v41  ;;  %1575 = vst [vmem:[%s2800_s21 + $0x80] sm:$0xff] %v1543_v20  ;;  %v1352_v43 = vsel %vm1320_vm0, -1.0, %v2319_v60  ;;  %vm1229_vm11 = vcmp.le.f32.partialorder %v3166_v61, -1.0  ;;  %vm1163_vm13 = vcmp.ge.f32.partialorder %v3168_v6, 1.0  ;;  %vm1227_vm9 = vcmp.le.f32.partialorder %v3168_v6, -1.0 }
 0x18b   : > { %1482 = vst [vmem:[%s2796_s20 + $0x98] sm:$0xff] %v1450_v28  ;;  %1578 = vst [vmem:[%s2800_s21 + $0x98] sm:$0xff] %v1546_v57  ;;  %v1384_v16 = vadd.f32 %v1352_v43, %v1192_v39  ;;  %v1195_v18 = vsel %vm1163_vm13, 1.0, %v2319_v60  ;;  %v1070_v4 = vadd.f32 %v2733_v31, %v1031_v36  ;;  %vm1297_vm12 = vcmp.gt.f32.partialorder %v3174_v2, 0.0  ;;  %v1106_v20 = vld [vmem:[%s2530_s23 + $0xd8] sm:$0xff] }
 0x18c   : > { %vm1325_vm10 = vmand %vm1229_vm11, %vm1293_vm7  ;;  %v1068_v10 = vadd.f32 %v2733_v31, %v1029_v63  ;;  %v810_v29 = vadd.f32 %v3109_v49, %v2700_v13  ;;  %v802_v59 = vadd.f32 %v3136_v34, %v2704_v15  ;;  %vm1295_vm7 = vcmp.gt.f32.partialorder %v3189_v40, 0.0  ;;  %v2021_v15 = vpop.f32.mrf.mxu1 }
 0x18d   : > { %v1357_v46 = vsel %vm1325_vm10, -1.0, %v2319_v60  ;;  %vm1323_vm15 = vmand %vm1227_vm9, %vm1291_vm8  ;;  %1416 = vst [vmem:[%s2781_s18 + $0x88] sm:$0xff] %v1384_v16  ;;  %v1448_v5 = vsub.f32 %v1128_v53, %v1384_v16  ;;  %v1544_v12 = vadd.f32 %v1384_v16, %v3084_v55  ;;  %v1134_v9 = vadd.f32 %v1102_v45, %v1070_v4 }
 0x18e   : > { %v1389_v62 = vadd.f32 %v1357_v46, %v1197_v54  ;;  %v1355_v48 = vsel %vm1323_vm15, -1.0, %v2319_v60  ;;  %v3218_v33 = vadd.f32 %v1100_v32, %v1068_v10  ;;  %v1034_v13 = vadd.f32 %v3145_v56, %v810_v29  ;;  %v817_v14 = vpop.f32.mrf.mxu1 }
 0x18f   : > { %v1387_v7 = vadd.f32 %v1355_v48, %v1195_v18  ;;  %1480 = vst [vmem:[%s2796_s20 + $0x88] sm:$0xff] %v1448_v5  ;;  %1576 = vst [vmem:[%s2800_s21 + $0x88] sm:$0xff] %v1544_v12  ;;  %v1032_v34 = vadd.f32 %v977_v47, %v802_v59  ;;  %v813_v11 = vadd.f32 %v2018_v37, %v2708_v17  ;;  %vm1298_vm8 = vcmp.gt.f32.partialorder %v3212_v3, 0.0  ;;  %v1109_v5 = vld [vmem:[%s2530_s23 + $0xf0] sm:$0xff] }
 0x190   : > { %1421 = vst [vmem:[%s2781_s18 + $0xb0] sm:$0xff] %v1389_v62  ;;  %v1453_v55 = vsub.f32 %v3166_v61, %v1389_v62  ;;  %v1549_v49 = vadd.f32 %v1389_v62, %v3093_v1  ;;  %vm1166_vm1 = vcmp.ge.f32.partialorder %v1134_v9, 1.0  ;;  %vm1230_vm14 = vcmp.le.f32.partialorder %v1134_v9, -1.0  ;;  %v2055_v61 = vpop.f32.mrf.mxu0 }
 0x191   : > { %1419 = vst [vmem:[%s2781_s18 + $0xa0] sm:$0xff] %v1387_v7  ;;  %v1451_v56 = vsub.f32 %v3168_v6, %v1387_v7  ;;  %v1547_v26 = vadd.f32 %v1387_v7, %v3107_v38  ;;  %v1198_v1 = vsel %vm1166_vm1, 1.0, %v2319_v60  ;;  %vm1326_vm2 = vmand %vm1230_vm14, %vm1294_vm3  ;;  %vm1164_vm5 = vcmp.ge.f32.partialorder %v3218_v33, 1.0  ;;  %v3255_v6 = vld [vmem:[%s2538_s9 + $0xf0] sm:$0xff] }
 0x192   : > { %1485 = vst [vmem:[%s2796_s20 + $0xb0] sm:$0xff] %v1453_v55  ;;  %1581 = vst [vmem:[%s2800_s21 + $0xb0] sm:$0xff] %v1549_v49  ;;  %vm1228_vm0 = vcmp.le.f32.partialorder %v3218_v33, -1.0  ;;  %v1073_v17 = vadd.f32 %v2733_v31, %v1034_v13  ;;  %v1358_v38 = vsel %vm1326_vm2, -1.0, %v2319_v60  ;;  %v1196_v8 = vsel %vm1164_vm5, 1.0, %v2319_v60 }
 0x193   : > { %1483 = vst [vmem:[%s2796_s20 + $0xa0] sm:$0xff] %v1451_v56  ;;  %1579 = vst [vmem:[%s2800_s21 + $0xa0] sm:$0xff] %v1547_v26  ;;  %v1071_v42 = vadd.f32 %v2733_v31, %v1032_v34  ;;  %v1035_v58 = vadd.f32 %v2052_v51, %v813_v11  ;;  %v1390_v53 = vadd.f32 %v1358_v38, %v1198_v1  ;;  %vm1296_vm11 = vcmp.gt.f32.partialorder %v3249_v30, 0.0  ;;  %v1107_v56 = vld [vmem:[%s2530_s23 + $0xe0] sm:$0xff]  ;;  %v1110_v26 = vld [vmem:[%s2530_s23 + $0xf8] sm:$0xff] }
 0x194   : > { %vm1324_vm4 = vmand %vm1228_vm0, %vm1292_vm6  ;;  %v1137_v37 = vadd.f32 %v1105_v0, %v1073_v17  ;;  %v805_v44 = vadd.f32 %v3191_v52, %v2712_v19  ;;  %v826_v28 = vadd.f32 %v2021_v15, %v2716_v21  ;;  %vm1301_vm9 = vcmp.gt.f32.partialorder %v3255_v6, 0.0  ;;  %v2022_v21 = vpop.f32.mrf.mxu1  ;;  %v993_v52 = vpop.f32.mrf.mxu0 }
 0x195   : > { %v1356_v36 = vsel %vm1324_vm4, -1.0, %v2319_v60  ;;  %v3257_v47 = vadd.f32 %v1103_v35, %v1071_v42  ;;  %v1074_v41 = vadd.f32 %v2733_v31, %v1035_v58  ;;  %1422 = vst [vmem:[%s2781_s18 + $0xb8] sm:$0xff] %v1390_v53  ;;  %v1454_v57 = vsub.f32 %v1134_v9, %v1390_v53  ;;  %v3301_v9 = vld [vmem:[%s2538_s9 + $0xe0] sm:$0xff]  ;;  %v1270_v35 = vld [vmem:[%s2538_s9 + $0xf8] sm:$0xff] }
 0x196   : > { %v1388_v63 = vadd.f32 %v1356_v36, %v1196_v8  ;;  %v1550_v39 = vadd.f32 %v1390_v53, %v3143_v50  ;;  %vm1169_vm3 = vcmp.ge.f32.partialorder %v1137_v37, 1.0  ;;  %vm1233_vm6 = vcmp.le.f32.partialorder %v1137_v37, -1.0  ;;  %v820_v12 = vpop.f32.mrf.mxu1 }
 0x197   : > { %v1201_v43 = vsel %vm1169_vm3, 1.0, %v2319_v60  ;;  %vm1329_vm13 = vmand %vm1233_vm6, %vm1297_vm12  ;;  %vm1167_vm10 = vcmp.ge.f32.partialorder %v3257_v47, 1.0  ;;  %1486 = vst [vmem:[%s2796_s20 + $0xb8] sm:$0xff] %v1454_v57  ;;  %vm1231_vm15 = vcmp.le.f32.partialorder %v3257_v47, -1.0  ;;  %v1033_v18 = vadd.f32 %v980_v24, %v805_v44 }
 0x198   : > { %1420 = vst [vmem:[%s2781_s18 + $0xa8] sm:$0xff] %v1388_v63  ;;  %v1452_v19 = vsub.f32 %v3218_v33, %v1388_v63  ;;  %v1548_v31 = vadd.f32 %v1388_v63, %v3155_v22  ;;  %1582 = vst [vmem:[%s2800_s21 + $0xb8] sm:$0xff] %v1550_v39  ;;  %v1361_v50 = vsel %vm1329_vm13, -1.0, %v2319_v60  ;;  %v1199_v54 = vsel %vm1167_vm10, 1.0, %v2319_v60  ;;  %v2056_v33 = vpop.f32.mrf.mxu0 }
 0x199   : > { %v1138_v22 = vadd.f32 %v1106_v20, %v1074_v41  ;;  %v1393_v16 = vadd.f32 %v1361_v50, %v1201_v43  ;;  %vm1327_vm12 = vmand %vm1231_vm15, %vm1295_vm7  ;;  %v1038_v4 = vadd.f32 %v2055_v61, %v826_v28  ;;  %v818_v45 = vadd.f32 %v817_v14, %v2720_v23  ;;  %v1104_v23 = vld [vmem:[%s2530_s23 + $0xc8] sm:$0xff] }
 0x19a   : > { %1484 = vst [vmem:[%s2796_s20 + $0xa8] sm:$0xff] %v1452_v19  ;;  %1580 = vst [vmem:[%s2800_s21 + $0xa8] sm:$0xff] %v1548_v31  ;;  %v1359_v32 = vsel %vm1327_vm12, -1.0, %v2319_v60  ;;  %v829_v51 = vadd.f32 %v2022_v21, %v2724_v25  ;;  %v3296_v25 = vld [vmem:[%s3485_s2] ss:$0 sm:$0xff]  ;;  %v821_v0 = vadd.f32 %v820_v12, %v2728_v27  ;;  %v996_v42 = vpop.f32.mrf.mxu0  ;;  %vm1302_vm13 = vcmp.gt.f32.partialorder %v1270_v35, 0.0 }
 0x19b   : > { %vm1170_vm1 = vcmp.ge.f32.partialorder %v1138_v22, 1.0  ;;  %vm1234_vm14 = vcmp.le.f32.partialorder %v1138_v22, -1.0  ;;  %1425 = vst [vmem:[%s2781_s18 + $0xd0] sm:$0xff] %v1393_v16  ;;  %v1457_v46 = vsub.f32 %v1137_v37, %v1393_v16  ;;  %v1553_v10 = vadd.f32 %v1393_v16, %v3174_v2  ;;  %v1108_v19 = vld [vmem:[%s2530_s23 + $0xe8] sm:$0xff]  ;;  %s1901_s23 = sshll.u32 %s2386_s28, 12 }
 0x19c   : > { %v1391_v29 = vadd.f32 %v1359_v32, %v1199_v54  ;;  %v1202_v59 = vsel %vm1170_vm1, 1.0, %v2319_v60  ;;  %vm1330_vm7 = vmand %vm1234_vm14, %vm1298_vm8  ;;  %v1072_v2 = vadd.f32 %v3296_v25, %v1033_v18  ;;  %v1077_v48 = vadd.f32 %v3296_v25, %v1038_v4  ;;  %v1268_v31 = vld [vmem:[%s2538_s9 + $0xe8] sm:$0xff]  ;;  %s1615_s9 = sshll.u32 %s2781_s18, 4  ;;  %s3364_s11 = scalar_lea.hbm %s3488_s5, %s1901_s23  ;;  %s3366_s9 = int_to_ptr.vmem [resolvable:$true] %s1615_s9 }
 0x19d   : > { %v1362_v62 = vsel %vm1330_vm7, -1.0, %v2319_v60  ;;  %v1036_v7 = vadd.f32 %v993_v52, %v818_v45  ;;  %1489 = vst [vmem:[%s2796_s20 + $0xd0] sm:$0xff] %v1457_v46  ;;  %1585 = vst [vmem:[%s2800_s21 + $0xd0] sm:$0xff] %v1553_v10  ;;  %v1039_v49 = vadd.f32 %v2056_v33, %v829_v51  ;;  %vm1299_vm8 = vcmp.gt.f32.partialorder %v3301_v9, 0.0  ;;  %s3371_s17 = scalar_lea.hbm %s3489_s6, %s1901_s23  ;;  %s3376_s0 = scalar_lea.hbm %s3490_s7, %s1901_s23 }
 0x19e   : > { %1423 = vst [vmem:[%s2781_s18 + $0xc0] sm:$0xff] %v1391_v29  ;;  %v1455_v13 = vsub.f32 %v3257_v47, %v1391_v29  ;;  %v1551_v15 = vadd.f32 %v1391_v29, %v3189_v40  ;;  %v1394_v55 = vadd.f32 %v1362_v62, %v1202_v59  ;;  %v1136_v34 = vadd.f32 %v1104_v23, %v1072_v2  ;;  %s2189_s22 = scalar_lea.vmem %s3366_s9, 4096  ;;  %p2196_p0 = scmp.lt.s32.totalorder %s3366_s9, %s2194_s16 }
 0x19f   : > { %v1141_v11 = vadd.f32 %v1109_v5, %v1077_v48  ;;  %v1075_v24 = vadd.f32 %v3296_v25, %v1036_v7  ;;  %v1078_v40 = vadd.f32 %v3296_v25, %v1039_v49  ;;  %v1037_v14 = vadd.f32 %v996_v42, %v821_v0  ;;  %p2190_p1 = scmp.ne.s32.totalorder %s3366_s9, %s2189_s22  ;;  %p2197_p2 = scmp.lt.s32.totalorder %s2195_s15, %s2189_s22 }
 0x1a0   : > { %1487 = vst [vmem:[%s2796_s20 + $0xc0] sm:$0xff] %v1455_v13  ;;  %1583 = vst [vmem:[%s2800_s21 + $0xc0] sm:$0xff] %v1551_v15  ;;  %v1458_v1 = vsub.f32 %v1138_v22, %v1394_v55  ;;  %v1554_v17 = vadd.f32 %v1394_v55, %v3212_v3  ;;  %vm1168_vm2 = vcmp.ge.f32.partialorder %v1136_v34, 1.0  ;;  %vm1232_vm5 = vcmp.le.f32.partialorder %v1136_v34, -1.0 }
 0x1a1   : > { %1426 = vst [vmem:[%s2781_s18 + $0xd8] sm:$0xff] %v1394_v55  ;;  %vm1173_vm0 = vcmp.ge.f32.partialorder %v1141_v11, 1.0  ;;  %vm1237_vm4 = vcmp.le.f32.partialorder %v1141_v11, -1.0  ;;  %v1200_v38 = vsel %vm1168_vm2, 1.0, %v2319_v60  ;;  %vm1328_vm3 = vmand %vm1232_vm5, %vm1296_vm11  ;;  %v1139_v8 = vadd.f32 %v1107_v56, %v1075_v24  ;;  %p2191_p7 = pnand %p2190_p1, %p3514_p12  ;;  %p2198_p4 = por %p2197_p2, %p2196_p0 }
 0x1a2   : > { %1490 = vst [vmem:[%s2796_s20 + $0xd8] sm:$0xff] %v1458_v1  ;;  %1586 = vst [vmem:[%s2800_s21 + $0xd8] sm:$0xff] %v1554_v17  ;;  %v1205_v27 = vsel %vm1173_vm0, 1.0, %v2319_v60  ;;  %v1142_v3 = vadd.f32 %v1110_v26, %v1078_v40  ;;  %v1360_v58 = vsel %vm1328_vm3, -1.0, %v2319_v60  ;;  %v1076_v43 = vadd.f32 %v3296_v25, %v1037_v14 }
 0x1a3   : > { %vm1333_vm6 = vmand %vm1237_vm4, %vm1301_vm9  ;;  %v1392_v53 = vadd.f32 %v1360_v58, %v1200_v38  ;;  %vm1171_vm10 = vcmp.ge.f32.partialorder %v1139_v8, 1.0  ;;  %vm1235_vm15 = vcmp.le.f32.partialorder %v1139_v8, -1.0  ;;  %vm1300_vm14 = vcmp.gt.f32.partialorder %v1268_v31, 0.0  ;;  %p2192_p10 = pneg %p2191_p7 }
 0x1a4   : > { %v1365_v36 = vsel %vm1333_vm6, -1.0, %v2319_v60  ;;  %v1203_v44 = vsel %vm1171_vm10, 1.0, %v2319_v60  ;;  %vm1331_vm11 = vmand %vm1235_vm15, %vm1299_vm8  ;;  %vm1174_vm12 = vcmp.ge.f32.partialorder %v1142_v3, 1.0  ;;  %vm1238_vm9 = vcmp.le.f32.partialorder %v1142_v3, -1.0 }
 0x1a5   : > { %v1397_v37 = vadd.f32 %v1365_v36, %v1205_v27  ;;  %1424 = vst [vmem:[%s2781_s18 + $0xc8] sm:$0xff] %v1392_v53  ;;  %v1456_v61 = vsub.f32 %v1136_v34, %v1392_v53  ;;  %v1552_v63 = vadd.f32 %v1392_v53, %v3249_v30  ;;  %v1363_v47 = vsel %vm1331_vm11, -1.0, %v2319_v60  ;;  %vm1334_vm1 = vmand %vm1238_vm9, %vm1302_vm13  ;;  %p2199_p9 = pnand %p2198_p4, %p2192_p10 }
 0x1a6   : > { %v1206_v41 = vsel %vm1174_vm12, 1.0, %v2319_v60  ;;  %v1395_v57 = vadd.f32 %v1363_v47, %v1203_v44  ;;  %v1366_v39 = vsel %vm1334_vm1, -1.0, %v2319_v60  ;;  %v1140_v22 = vadd.f32 %v1108_v19, %v1076_v43 }
 0x1a7   : > { %1429 = vst [vmem:[%s2781_s18 + $0xf0] sm:$0xff] %v1397_v37  ;;  %v1461_v20 = vsub.f32 %v1141_v11, %v1397_v37  ;;  %v1557_v28 = vadd.f32 %v1397_v37, %v3255_v6  ;;  %1488 = vst [vmem:[%s2796_s20 + $0xc8] sm:$0xff] %v1456_v61  ;;  %v1398_v30 = vadd.f32 %v1366_v39, %v1206_v41 }
 0x1a8   : > { %1584 = vst [vmem:[%s2800_s21 + $0xc8] sm:$0xff] %v1552_v63  ;;  %1427 = vst [vmem:[%s2781_s18 + $0xe0] sm:$0xff] %v1395_v57  ;;  %v1459_v6 = vsub.f32 %v1139_v8, %v1395_v57  ;;  %v1555_v21 = vadd.f32 %v1395_v57, %v3301_v9  ;;  %vm1172_vm7 = vcmp.ge.f32.partialorder %v1140_v22, 1.0  ;;  %vm1236_vm8 = vcmp.le.f32.partialorder %v1140_v22, -1.0 }
 0x1a9   : > { %1493 = vst [vmem:[%s2796_s20 + $0xf0] sm:$0xff] %v1461_v20  ;;  %1589 = vst [vmem:[%s2800_s21 + $0xf0] sm:$0xff] %v1557_v28  ;;  %v1462_v50 = vsub.f32 %v1142_v3, %v1398_v30  ;;  %v1558_v54 = vadd.f32 %v1398_v30, %v1270_v35  ;;  %v1204_v52 = vsel %vm1172_vm7, 1.0, %v2319_v60 }
 0x1aa   : > { %1430 = vst [vmem:[%s2781_s18 + $0xf8] sm:$0xff] %v1398_v30  ;;  %1491 = vst [vmem:[%s2796_s20 + $0xe0] sm:$0xff] %v1459_v6 }
 0x1ab   : > { %1587 = vst [vmem:[%s2800_s21 + $0xe0] sm:$0xff] %v1555_v21  ;;  %1494 = vst [vmem:[%s2796_s20 + $0xf8] sm:$0xff] %v1462_v50 }
 0x1ac   : > { %1590 = vst [vmem:[%s2800_s21 + $0xf8] sm:$0xff] %v1558_v54  ;;  %vm1332_vm2 = vmand %vm1236_vm8, %vm1300_vm14 }
 0x1ad   : > { %v1364_v16 = vsel %vm1332_vm2, -1.0, %v2319_v60 }
 0x1ae   : > { %v1396_v18 = vadd.f32 %v1364_v16, %v1204_v52 }
 0x1b0   : > { %1428 = vst [vmem:[%s2781_s18 + $0xe8] sm:$0xff] %v1396_v18  ;;  %v1460_v60 = vsub.f32 %v1140_v22, %v1396_v18  ;;  %v1556_v4 = vadd.f32 %v1396_v18, %v1268_v31 }
 0x1b1   : > { %2202 = shalt.err (!%p2199_p9)
}
 0x1b2   : > { %s2203_s18 = scalar_lea.hbm %s3364_s11, 4096  ;;  %s2207_s10 = scalar_lea.hbm %s3488_s5, 8192 }
 0x1b3   : > { %p2204_p11 = scmp.ne.s32.totalorder %s3364_s11, %s2203_s18  ;;  %p2208_p8 = scmp.lt.s32.totalorder %s3364_s11, %s3488_s5 }
 0x1b4   : > { %p2209_p6 = scmp.lt.s32.totalorder %s2207_s10, %s2203_s18 }
 0x1b5   : > { %p2205_p3 = pnand %p2204_p11, %p3514_p12 }
 0x1b6   : > { %p2210_p13 = por %p2209_p6, %p2208_p8 }
 0x1b7   : > { %p2206_p5 = pneg %p2205_p3 }
 0x1b9   : > { %p2211_p1 = pnand %p2210_p13, %p2206_p5 }
 0x1bb   : > { %2214 = shalt.err (!%p2211_p1)
}
 0x1bc   : > { %s2321_s22 = smov 128   ;;  %s2322_s16 = smov 8   ;;  %1492 = vst [vmem:[%s2796_s20 + $0xe8] sm:$0xff] %v1460_v60  ;;  %1588 = vst [vmem:[%s2800_s21 + $0xe8] sm:$0xff] %v1556_v4 }
 0x1bd   : > { %s3515_s1 = scalar_lea.sflag [#allocation4], %s2523_s8  ;;  %s3516_s19 = sand.u32 1, %s2386_s28  }
 0x1be   : > { %2067 = dma.vmem_to_hbm [thread:$0]  (%p3514_p12), %s3366_s9, 4096, %s3364_s11, %s3515_s1, %s2321_s22, %s2321_s22, %s2322_s16  }
 0x1bf   : > { %s3413_s15 = scalar_lea.sflag [#allocation9], %s3516_s19  ;;  %s2215_s18 = scalar_lea.vmem %s3379_s29, 4096 }
 0x1c0   : > { %p2216_p7 = scmp.ne.s32.totalorder %s3379_s29, %s2215_s18  ;;  %s2323_s23 = smov [#allocation8]  }
 0x1c1   : > { %s2219_s3 = sshll.u32 %s2323_s23, 4  ;;  %s2220_s3 = int_to_ptr.vmem [resolvable:$false] %s2219_s3 }
 0x1c2   : > { %p2217_p10 = pnand %p2216_p7, %p3514_p12  ;;  %s2221_s10 = scalar_lea.vmem %s2220_s3, 8192 }
 0x1c3   : > { %p2222_p2 = scmp.lt.s32.totalorder %s3379_s29, %s2220_s3  ;;  %p2223_p4 = scmp.lt.s32.totalorder %s2221_s10, %s2215_s18 }
 0x1c4   : > { %p2218_p0 = pneg %p2217_p10 }
 0x1c5   : > { %p2224_p9 = por %p2223_p4, %p2222_p2 }
 0x1c7   : > { %p2225_p11 = pnand %p2224_p9, %p2218_p0 }
 0x1c9   : > { %2228 = shalt.err (!%p2225_p11)
}
 0x1ca   : > { %s2229_s28 = scalar_lea.hbm %s3371_s17, 4096  ;;  %s2233_s21 = scalar_lea.hbm %s3489_s6, 8192 }
 0x1cb   : > { %p2230_p3 = scmp.ne.s32.totalorder %s3371_s17, %s2229_s28  ;;  %p2234_p6 = scmp.lt.s32.totalorder %s3371_s17, %s3489_s6 }
 0x1cc   : > { %p2235_p13 = scmp.lt.s32.totalorder %s2233_s21, %s2229_s28 }
 0x1cd   : > { %p2231_p5 = pnand %p2230_p3, %p3514_p12 }
 0x1ce   : > { %p2236_p1 = por %p2235_p13, %p2234_p6 }
 0x1cf   : > { %p2232_p8 = pneg %p2231_p5 }
 0x1d1   : > { %p2237_p7 = pnand %p2236_p1, %p2232_p8 }
 0x1d3   : > { %2240 = shalt.err (!%p2237_p7)
}
 0x1d4   : > { %2068 = dma.vmem_to_hbm [thread:$0]  (%p3514_p12), %s3379_s29, 4096, %s3371_s17, %s3413_s15, %s2321_s22, %s2321_s22, %s2322_s16  }
 0x1d5   : > { %s2241_s1 = scalar_lea.vmem %s3381_s12, 4096  ;;  %s2324_s19 = smov [#allocation10]  }
 0x1d6   : > { %p2242_p10 = scmp.ne.s32.totalorder %s3381_s12, %s2241_s1  ;;  %s2245_s18 = sshll.u32 %s2324_s19, 4  ;;  %s2246_s18 = int_to_ptr.vmem [resolvable:$false] %s2245_s18 }
 0x1d7   : > { %s2247_s23 = scalar_lea.vmem %s2246_s18, 8192  ;;  %p2248_p4 = scmp.lt.s32.totalorder %s3381_s12, %s2246_s18 }
 0x1d8   : > { %p2243_p0 = pnand %p2242_p10, %p3514_p12  ;;  %p2249_p9 = scmp.lt.s32.totalorder %s2247_s23, %s2241_s1 }
 0x1da   : > { %p2244_p2 = pneg %p2243_p0  ;;  %p2250_p11 = por %p2249_p9, %p2248_p4 }
 0x1dc   : > { %p2251_p3 = pnand %p2250_p11, %p2244_p2 }
 0x1de   : > { %2254 = shalt.err (!%p2251_p3)
}
 0x1df   : > { %s2255_s3 = scalar_lea.hbm %s3376_s0, 4096  ;;  %s2259_s10 = scalar_lea.hbm %s3490_s7, 8192 }
 0x1e0   : > { %p2256_p5 = scmp.ne.s32.totalorder %s3376_s0, %s2255_s3  ;;  %p2260_p13 = scmp.lt.s32.totalorder %s3376_s0, %s3490_s7 }
 0x1e1   : > { %p2261_p1 = scmp.lt.s32.totalorder %s2259_s10, %s2255_s3 }
 0x1e2   : > { %p2257_p8 = pnand %p2256_p5, %p3514_p12 }
 0x1e3   : > { %p2262_p7 = por %p2261_p1, %p2260_p13 }
 0x1e4   : > { %p2258_p6 = pneg %p2257_p8 }
 0x1e6   : > { %p2263_p10 = pnand %p2262_p7, %p2258_p6 }
 0x1e8   : > { %2266 = shalt.err (!%p2263_p10)
}
 0x1e9   : > { %2069 = dma.vmem_to_hbm [thread:$0]  (%p3514_p12), %s3381_s12, 4096, %s3376_s0, %s3413_s15, %s2321_s22, %s2321_s22, %s2322_s16  }
 0x1ea PF: > { %s1662_s20 = sand.u32 1, %s2301_s24   ;;  %p3517_p0 = scmp.ne.s32.totalorder %s3504_s14, 0 }
 0x1eb   : > { %p3518_p2 = scmp.ge.s32.totalorder %s2313_s27, 2  ;;  %s1663_s21 = scalar_lea.sflag [#allocation4], %s1662_s20 }
 0x1ed   : > { %p2081_p4 = pnand %p3518_p2, %p3517_p0 }
 0x1ef   : > { %p2082_p9 = pneg %p2081_p4 }
 0x1f1   : > { %2292 = dma.done.wait (%p2082_p9), %s1663_s21, 4096  }
 0x1f2   : > { %2294 = vsyncadd (%p2082_p9), %s1663_s21, 4294963200  ;;  %s3519_s13 = sadd.s32 4294967294, %s2313_s27  }
 0x1f3   : > { %s1671_s9 = sand.u32 1, %s3519_s13  }
 0x1f4   : > { %s1672_s11 = scalar_lea.sflag [#allocation9], %s1671_s9 }
 0x1f5   : > { %2296 = dma.done.wait (%p2082_p9), %s1672_s11, 8192  }
 0x1f6   : > { %2298 = vsyncadd (%p2082_p9), %s1672_s11, 4294959104  ;;  %s3520_s0 = sld [smem:[#allocation15_spill]]  ;;  %p27_p12 = scmp.ge.s32.totalorder %s2390_s30, 4  }
 0x1f7   : > { %s3521_s24 = smov %s2305_s25  ;;  %s3522_s25 = smov %s2309_s26 }
 0x1f8   : > { %s3524_s27 = smov %s2390_s30  ;;  %29 = sbr.rel (!%p27_p12) target bundleno = 13 (0xd), region = 135 }
 0x1fc   : > { %s3523_s26 = smov %s3520_s0 }
 0x1fd   :  { %1686 = vsyncpa [#allocation3], 1 }
 0x1fe   :  { %1688 = vsyncpa [#allocation3 + $0x1], 1 }
 0x1ff   :  { %1689 = vsyncpa [#allocation6], 1 }
 0x200   :  { %1691 = vsyncpa [#allocation6 + $0x1], 1 }
 0x201   :  { %1692 = vsyncpa [#allocation4], 1 }
 0x202   :  { %1694 = vsyncpa [#allocation4 + $0x1], 1 }
 0x203   :  { %1695 = vsyncpa [#allocation9], 1 }
 0x204   :  { %1697 = vsyncpa [#allocation9 + $0x1], 1 }

</bundles_post_ra>
